<compile_context>
chip_gen: v5e
topology: v5e:2x2
jax: 0.10.0
libtpu: 0.0.40
codegen_flags: <defaults>
</compile_context>

<pallas_src>
import jax
import jax.numpy as jnp
from jax.experimental import pallas as pl
from jax.experimental.pallas import tpu as pltpu

NEG_SLOPE = 0.1  # nn.LeakyReLU(negative_slope=0.1)


def _make_kernel(H, W, C):
    """Kernel closure over static spatial / channel sizes."""
    Wp = W + 2                  # padded row width
    N = H * Wp                  # flattened output extent (incl. pad columns)
    Lx = (H + 2) * Wp + 2       # flattened padded input extent (+1 col each end)

    def kernel(xp_ref, w1_ref, b1_ref, w2_ref, b2_ref, o_ref, col_ref, h1_ref):
        # xp_ref : (1, C, Lx)   zero-padded, flattened input (single DMA)
        # w*_ref : (C, 9*C)     fused conv weights (tap-major, channel-minor)
        # b*_ref : (C, 1)       conv biases
        # o_ref  : (1, C, N)    flattened output (padding columns are garbage,
        #                       sliced off in the wrapper)
        # col_ref: (9*C, N)     VMEM im2col scratch (reused by both convs)
        # h1_ref : (C, Lx)      VMEM padded relu(conv1(x))

        # ---- conv1: gather 9 taps as contiguous slices of the flat axis,
        #      then a single fat MXU matmul. ----
        for dy in range(3):
            for dx in range(3):
                t = 3 * dy + dx
                col_ref[t * C:(t + 1) * C, :] = \
                    xp_ref[0, :, dy * Wp + dx: dy * Wp + dx + N]
        h1 = jnp.dot(w1_ref[...], col_ref[...],
                     preferred_element_type=jnp.float32)        # (C, N)
        h1 = h1 + b1_ref[...]                                   # (C,1) bcast
        h1 = jnp.where(h1 > 0, h1, NEG_SLOPE * h1)

        # conv2 must see zeros at the left/right padding columns: mask them.
        lane = jax.lax.broadcasted_iota(jnp.int32, (C, N), 1) % Wp
        h1 = jnp.where((lane == 0) | (lane == W + 1), 0.0, h1)

        # Padded-h1 scratch: only the top/bottom padding strips are written
        # explicitly (tiny); the interior is fully overwritten every step.
        h1_ref[:, 0:Wp + 1] = jnp.zeros((C, Wp + 1), jnp.float32)
        h1_ref[:, Wp + 1 + N:Lx] = jnp.zeros((C, Wp + 1), jnp.float32)
        h1_ref[:, Wp + 1:Wp + 1 + N] = h1

        # ---- conv2: same im2col-on-the-flat-axis trick on padded h1 ----
        for dy in range(3):
            for dx in range(3):
                t = 3 * dy + dx
                col_ref[t * C:(t + 1) * C, :] = \
                    h1_ref[:, dy * Wp + dx: dy * Wp + dx + N]
        out = jnp.dot(w2_ref[...], col_ref[...],
                      preferred_element_type=jnp.float32)       # (C, N)
        out = out + b2_ref[...]

        # residual: identity = interior of the (already loaded) padded input
        out = out + xp_ref[0, :, Wp + 1:Wp + 1 + N]
        o_ref[0] = jnp.where(out > 0, out, NEG_SLOPE * out)

    return kernel


def basic_block_normal(x_nchw, w1_oihw, b1, w2_oihw, b2):
    """x_nchw: (B, C, H, W) float32; weights in PyTorch OIHW layout."""
    B, Cin, H, W = x_nchw.shape
    Cout = w1_oihw.shape[0]
    assert Cin == Cout, "stride=1 / downsample=None requires inplanes == planes"
    C = Cout
    Wp = W + 2
    N = H * Wp
    Lx = (H + 2) * Wp + 2

    x = x_nchw.astype(jnp.float32)
    # pad=1 on H and W, flatten the spatial dims (free: row-major layout),
    # then one extra zero column at each end so every conv tap is a single
    # contiguous slice of the flat axis.  This is the only input DMA.
    xp = jnp.pad(x, ((0, 0), (0, 0), (1, 1), (1, 1))).reshape(B, C, (H + 2) * Wp)
    xp = jnp.pad(xp, ((0, 0), (0, 0), (1, 1)))                     # (B, C, Lx)

    # fused (Cout, 9*Cin) weight matrices, tap-major / channel-minor so they
    # match the im2col row order built in the kernel.
    w1m = jnp.transpose(w1_oihw.astype(jnp.float32), (0, 2, 3, 1)).reshape(C, 9 * C)
    w2m = jnp.transpose(w2_oihw.astype(jnp.float32), (0, 2, 3, 1)).reshape(C, 9 * C)
    b1c = b1.astype(jnp.float32).reshape(C, 1)
    b2c = b2.astype(jnp.float32).reshape(C, 1)

    kernel = _make_kernel(H, W, C)

    out_flat = pl.pallas_call(
        kernel,
        out_shape=jax.ShapeDtypeStruct((B, C, N), jnp.float32),
        grid_spec=pltpu.PrefetchScalarGridSpec(
            num_scalar_prefetch=0,
            grid=(B,),
            in_specs=[
                pl.BlockSpec((1, C, Lx), lambda b: (b, 0, 0)),
                pl.BlockSpec((C, 9 * C), lambda b: (0, 0)),
                pl.BlockSpec((C, 1), lambda b: (0, 0)),
                pl.BlockSpec((C, 9 * C), lambda b: (0, 0)),
                pl.BlockSpec((C, 1), lambda b: (0, 0)),
            ],
            out_specs=pl.BlockSpec((1, C, N), lambda b: (b, 0, 0)),
            scratch_shapes=[
                pltpu.VMEM((9 * C, N), jnp.float32),   # im2col matrix
                pltpu.VMEM((C, Lx), jnp.float32),      # padded relu(conv1(x))
            ],
        ),
        compiler_params=pltpu.CompilerParams(
            dimension_semantics=("parallel",),
            vmem_limit_bytes=32 * 1024 * 1024),
    )(xp, w1m, b1c, w2m, b2c)

    # drop the per-row padding columns and restore NCHW
    return out_flat.reshape(B, C, H, Wp)[:, :, :, 1:W + 1]


def reference_forward(x, w1, b1, w2, b2):
    """Pure-JAX reference in NCHW, mirrors the PyTorch module."""
    dn = jax.lax.conv_dimension_numbers(x.shape, w1.shape,
                                        ("NCHW", "OIHW", "NCHW"))
    out = jax.lax.conv_general_dilated(x, w1, (1, 1), ((1, 1), (1, 1)),
                                       dimension_numbers=dn)
    out = out + b1[None, :, None, None]
    out = jnp.where(out > 0, out, NEG_SLOPE * out)
    out = jax.lax.conv_general_dilated(out, w2, (1, 1), ((1, 1), (1, 1)),
                                       dimension_numbers=dn)
    out = out + b2[None, :, None, None]
    out = out + x
    return jnp.where(out > 0, out, NEG_SLOPE * out)


if __name__ == "__main__":
    B, C, H, W = 2, 4, 16, 16   # inplanes = planes = 4, stride = 1
    key = jax.random.PRNGKey(0)
    kx, kw1, kb1, kw2, kb2 = jax.random.split(key, 5)

    x = jax.random.normal(kx, (B, C, H, W), dtype=jnp.float32)
    # Deterministic synthetic parameters (Conv2d(C, C, 3) shapes).
    w1 = 0.1 * jax.random.normal(kw1, (C, C, 3, 3), dtype=jnp.float32)
    b1 = 0.1 * jax.random.normal(kb1, (C,), dtype=jnp.float32)
    w2 = 0.1 * jax.random.normal(kw2, (C, C, 3, 3), dtype=jnp.float32)
    b2 = 0.1 * jax.random.normal(kb2, (C,), dtype=jnp.float32)

    out = basic_block_normal(x, w1, b1, w2, b2)
    out = jax.block_until_ready(out)

    ref = jax.block_until_ready(reference_forward(x, w1, b1, w2, b2))
    assert out.shape == ref.shape == (B, C, H, W)
    assert jnp.allclose(out, ref, atol=1e-4, rtol=1e-4), (
        float(jnp.max(jnp.abs(out - ref))))

    print("KERNEL_OK")
</pallas_src>

<mosaic_0001>
module attributes {stable_mosaic.version = 11 : i64} {
  func.func @kernel(%arg0: i32, %arg1: memref<1x4x326xf32, #tpu.memory_space<vmem>>, %arg2: memref<4x36xf32, #tpu.memory_space<vmem>>, %arg3: memref<4x1xf32, #tpu.memory_space<vmem>>, %arg4: memref<4x36xf32, #tpu.memory_space<vmem>>, %arg5: memref<4x1xf32, #tpu.memory_space<vmem>>, %arg6: memref<1x4x288xf32, #tpu.memory_space<vmem>>, %arg7: memref<36x288xf32, #tpu.memory_space<vmem>>, %arg8: memref<4x326xf32, #tpu.memory_space<vmem>>) attributes {dimension_semantics = [#tpu.dimension_semantics<parallel>], iteration_bounds = array<i64: 2>, scalar_prefetch = 0 : i64, scratch_operands = 2 : i64, tpu.core_type = #tpu.core_type<tc>, window_params = [{transform_indices = @transform_0, window_bounds = array<i64: 1, 4, 326>}, {pipeline_mode = #tpu.pipeline_mode<synchronous>, transform_indices = @transform_1, window_bounds = array<i64: 4, 36>}, {pipeline_mode = #tpu.pipeline_mode<synchronous>, transform_indices = @transform_2, window_bounds = array<i64: 4, 1>}, {pipeline_mode = #tpu.pipeline_mode<synchronous>, transform_indices = @transform_3, window_bounds = array<i64: 4, 36>}, {pipeline_mode = #tpu.pipeline_mode<synchronous>, transform_indices = @transform_4, window_bounds = array<i64: 4, 1>}, {transform_indices = @transform_5, window_bounds = array<i64: 1, 4, 288>}]} {
    %c0 = arith.constant 0 : index
    %c0_0 = arith.constant 0 : index
    %c0_1 = arith.constant 0 : index
    %0 = vector.load %arg1[%c0, %c0_0, %c0_1] : memref<1x4x326xf32, #tpu.memory_space<vmem>>, vector<1x4x288xf32>
    %1 = vector.shape_cast %0 : vector<1x4x288xf32> to vector<4x288xf32>
    %c0_2 = arith.constant 0 : index
    %c0_3 = arith.constant 0 : index
    %2 = vector.load %arg7[%c0_2, %c0_3] : memref<36x288xf32, #tpu.memory_space<vmem>>, vector<4x288xf32>
    tpu.vector_store %arg7[%c0_2, %c0_3], %1 {strides = array<i32>} : memref<36x288xf32, #tpu.memory_space<vmem>>, vector<4x288xf32>,
    %c0_4 = arith.constant 0 : index
    %c0_5 = arith.constant 0 : index
    %c1 = arith.constant 1 : index
    %3 = vector.load %arg1[%c0_4, %c0_5, %c1] : memref<1x4x326xf32, #tpu.memory_space<vmem>>, vector<1x4x288xf32>
    %4 = vector.shape_cast %3 : vector<1x4x288xf32> to vector<4x288xf32>
    %c4 = arith.constant 4 : index
    %c0_6 = arith.constant 0 : index
    %5 = vector.load %arg7[%c4, %c0_6] : memref<36x288xf32, #tpu.memory_space<vmem>>, vector<4x288xf32>
    tpu.vector_store %arg7[%c4, %c0_6], %4 {strides = array<i32>} : memref<36x288xf32, #tpu.memory_space<vmem>>, vector<4x288xf32>,
    %c0_7 = arith.constant 0 : index
    %c0_8 = arith.constant 0 : index
    %c2 = arith.constant 2 : index
    %6 = vector.load %arg1[%c0_7, %c0_8, %c2] : memref<1x4x326xf32, #tpu.memory_space<vmem>>, vector<1x4x288xf32>
    %7 = vector.shape_cast %6 : vector<1x4x288xf32> to vector<4x288xf32>
    %c8 = arith.constant 8 : index
    %c0_9 = arith.constant 0 : index
    %8 = vector.load %arg7[%c8, %c0_9] : memref<36x288xf32, #tpu.memory_space<vmem>>, vector<4x288xf32>
    tpu.vector_store %arg7[%c8, %c0_9], %7 {strides = array<i32>} : memref<36x288xf32, #tpu.memory_space<vmem>>, vector<4x288xf32>,
    %c0_10 = arith.constant 0 : index
    %c0_11 = arith.constant 0 : index
    %c18 = arith.constant 18 : index
    %9 = vector.load %arg1[%c0_10, %c0_11, %c18] : memref<1x4x326xf32, #tpu.memory_space<vmem>>, vector<1x4x288xf32>
    %10 = vector.shape_cast %9 : vector<1x4x288xf32> to vector<4x288xf32>
    %c12 = arith.constant 12 : index
    %c0_12 = arith.constant 0 : index
    %11 = vector.load %arg7[%c12, %c0_12] : memref<36x288xf32, #tpu.memory_space<vmem>>, vector<4x288xf32>
    tpu.vector_store %arg7[%c12, %c0_12], %10 {strides = array<i32>} : memref<36x288xf32, #tpu.memory_space<vmem>>, vector<4x288xf32>,
    %c0_13 = arith.constant 0 : index
    %c0_14 = arith.constant 0 : index
    %c19 = arith.constant 19 : index
    %12 = vector.load %arg1[%c0_13, %c0_14, %c19] : memref<1x4x326xf32, #tpu.memory_space<vmem>>, vector<1x4x288xf32>
    %13 = vector.shape_cast %12 : vector<1x4x288xf32> to vector<4x288xf32>
    %c16 = arith.constant 16 : index
    %c0_15 = arith.constant 0 : index
    %14 = vector.load %arg7[%c16, %c0_15] : memref<36x288xf32, #tpu.memory_space<vmem>>, vector<4x288xf32>
    tpu.vector_store %arg7[%c16, %c0_15], %13 {strides = array<i32>} : memref<36x288xf32, #tpu.memory_space<vmem>>, vector<4x288xf32>,
    %c0_16 = arith.constant 0 : index
    %c0_17 = arith.constant 0 : index
    %c20 = arith.constant 20 : index
    %15 = vector.load %arg1[%c0_16, %c0_17, %c20] : memref<1x4x326xf32, #tpu.memory_space<vmem>>, vector<1x4x288xf32>
    %16 = vector.shape_cast %15 : vector<1x4x288xf32> to vector<4x288xf32>
    %c20_18 = arith.constant 20 : index
    %c0_19 = arith.constant 0 : index
    %17 = vector.load %arg7[%c20_18, %c0_19] : memref<36x288xf32, #tpu.memory_space<vmem>>, vector<4x288xf32>
    tpu.vector_store %arg7[%c20_18, %c0_19], %16 {strides = array<i32>} : memref<36x288xf32, #tpu.memory_space<vmem>>, vector<4x288xf32>,
    %c0_20 = arith.constant 0 : index
    %c0_21 = arith.constant 0 : index
    %c36 = arith.constant 36 : index
    %18 = vector.load %arg1[%c0_20, %c0_21, %c36] : memref<1x4x326xf32, #tpu.memory_space<vmem>>, vector<1x4x288xf32>
    %19 = vector.shape_cast %18 : vector<1x4x288xf32> to vector<4x288xf32>
    %c24 = arith.constant 24 : index
    %c0_22 = arith.constant 0 : index
    %20 = vector.load %arg7[%c24, %c0_22] : memref<36x288xf32, #tpu.memory_space<vmem>>, vector<4x288xf32>
    tpu.vector_store %arg7[%c24, %c0_22], %19 {strides = array<i32>} : memref<36x288xf32, #tpu.memory_space<vmem>>, vector<4x288xf32>,
    %c0_23 = arith.constant 0 : index
    %c0_24 = arith.constant 0 : index
    %c37 = arith.constant 37 : index
    %21 = vector.load %arg1[%c0_23, %c0_24, %c37] : memref<1x4x326xf32, #tpu.memory_space<vmem>>, vector<1x4x288xf32>
    %22 = vector.shape_cast %21 : vector<1x4x288xf32> to vector<4x288xf32>
    %c28 = arith.constant 28 : index
    %c0_25 = arith.constant 0 : index
    %23 = vector.load %arg7[%c28, %c0_25] : memref<36x288xf32, #tpu.memory_space<vmem>>, vector<4x288xf32>
    tpu.vector_store %arg7[%c28, %c0_25], %22 {strides = array<i32>} : memref<36x288xf32, #tpu.memory_space<vmem>>, vector<4x288xf32>,
    %c0_26 = arith.constant 0 : index
    %c0_27 = arith.constant 0 : index
    %c38 = arith.constant 38 : index
    %24 = vector.load %arg1[%c0_26, %c0_27, %c38] : memref<1x4x326xf32, #tpu.memory_space<vmem>>, vector<1x4x288xf32>
    %25 = vector.shape_cast %24 : vector<1x4x288xf32> to vector<4x288xf32>
    %c32 = arith.constant 32 : index
    %c0_28 = arith.constant 0 : index
    %26 = vector.load %arg7[%c32, %c0_28] : memref<36x288xf32, #tpu.memory_space<vmem>>, vector<4x288xf32>
    tpu.vector_store %arg7[%c32, %c0_28], %25 {strides = array<i32>} : memref<36x288xf32, #tpu.memory_space<vmem>>, vector<4x288xf32>,
    %c0_29 = arith.constant 0 : index
    %c0_30 = arith.constant 0 : index
    %27 = vector.load %arg2[%c0_29, %c0_30] : memref<4x36xf32, #tpu.memory_space<vmem>>, vector<4x36xf32>
    %c0_31 = arith.constant 0 : index
    %c0_32 = arith.constant 0 : index
    %28 = vector.load %arg7[%c0_31, %c0_32] : memref<36x288xf32, #tpu.memory_space<vmem>>, vector<36x288xf32>
    %cst = arith.constant dense<0.000000e+00> : vector<4x288xf32>
    %29 = tpu.matmul %27, %28, %cst {dimension_numbers = #tpu.dot_dimension_numbers<[1], [0], [0], [1], [0, 0, 1, 1], [], []>} : vector<4x36xf32>, vector<36x288xf32>, vector<4x288xf32> -> vector<4x288xf32>
    %c0_33 = arith.constant 0 : index
    %c0_34 = arith.constant 0 : index
    %30 = vector.load %arg3[%c0_33, %c0_34] : memref<4x1xf32, #tpu.memory_space<vmem>>, vector<4x1xf32>
    %31 = vector.broadcast %30 : vector<4x1xf32> to vector<4x288xf32>
    %32 = arith.addf %29, %31 : vector<4x288xf32>
    %cst_35 = arith.constant 0.000000e+00 : f32
    %33 = vector.broadcast %cst_35 : f32 to vector<4x288xf32>
    %34 = arith.cmpf ogt, %32, %33 : vector<4x288xf32>
    %cst_36 = arith.constant 1.000000e-01 : f32
    %35 = vector.broadcast %cst_36 : f32 to vector<4x288xf32>
    %36 = arith.mulf %35, %32 : vector<4x288xf32>
    %37 = arith.select %34, %32, %36 : vector<4x288xi1>, vector<4x288xf32>
    %38 = tpu.iota {dimensions = array<i32: 1>} : vector<4x288xi32>
    %c18_i32 = arith.constant 18 : i32
    %c0_i32 = arith.constant 0 : i32
    %39 = arith.cmpi eq, %c18_i32, %c0_i32 : i32
    %c1_i32 = arith.constant 1 : i32
    %40 = arith.select %39, %c1_i32, %c18_i32 : i32
    %41 = vector.broadcast %40 : i32 to vector<4x288xi32>
    %42 = arith.remsi %38, %41 : vector<4x288xi32>
    %c0_i32_37 = arith.constant 0 : i32
    %43 = vector.broadcast %c0_i32_37 : i32 to vector<4x288xi32>
    %44 = arith.cmpi ne, %42, %43 : vector<4x288xi32>
    %c0_i32_38 = arith.constant 0 : i32
    %45 = vector.broadcast %c0_i32_38 : i32 to vector<4x288xi32>
    %46 = arith.cmpi slt, %42, %45 : vector<4x288xi32>
    %c0_i32_39 = arith.constant 0 : i32
    %47 = arith.cmpi slt, %40, %c0_i32_39 : i32
    %48 = vector.broadcast %47 : i1 to vector<4x288xi1>
    %49 = vector.broadcast %48 : vector<4x288xi1> to vector<4x288xi1>
    %50 = arith.xori %46, %49 : vector<4x288xi1>
    %51 = arith.andi %50, %44 : vector<4x288xi1>
    %52 = vector.broadcast %40 : i32 to vector<4x288xi32>
    %53 = arith.addi %42, %52 : vector<4x288xi32>
    %54 = arith.select %51, %53, %42 : vector<4x288xi1>, vector<4x288xi32>
    %c0_i32_40 = arith.constant 0 : i32
    %55 = vector.broadcast %c0_i32_40 : i32 to vector<4x288xi32>
    %56 = arith.cmpi eq, %54, %55 : vector<4x288xi32>
    %c17_i32 = arith.constant 17 : i32
    %57 = vector.broadcast %c17_i32 : i32 to vector<4x288xi32>
    %58 = arith.cmpi eq, %54, %57 : vector<4x288xi32>
    %59 = arith.ori %56, %58 : vector<4x288xi1>
    %cst_41 = arith.constant 0.000000e+00 : f32
    %60 = vector.broadcast %cst_41 : f32 to vector<4x288xf32>
    %61 = arith.select %59, %60, %37 : vector<4x288xi1>, vector<4x288xf32>
    %cst_42 = arith.constant 0.000000e+00 : f32
    %62 = vector.broadcast %cst_42 : f32 to vector<4x19xf32>
    %c0_43 = arith.constant 0 : index
    %c0_44 = arith.constant 0 : index
    %63 = vector.load %arg8[%c0_43, %c0_44] : memref<4x326xf32, #tpu.memory_space<vmem>>, vector<4x19xf32>
    tpu.vector_store %arg8[%c0_43, %c0_44], %62 {strides = array<i32>} : memref<4x326xf32, #tpu.memory_space<vmem>>, vector<4x19xf32>,
    %cst_45 = arith.constant 0.000000e+00 : f32
    %64 = vector.broadcast %cst_45 : f32 to vector<4x19xf32>
    %c0_46 = arith.constant 0 : index
    %c307 = arith.constant 307 : index
    %65 = vector.load %arg8[%c0_46, %c307] : memref<4x326xf32, #tpu.memory_space<vmem>>, vector<4x19xf32>
    tpu.vector_store %arg8[%c0_46, %c307], %64 {strides = array<i32>} : memref<4x326xf32, #tpu.memory_space<vmem>>, vector<4x19xf32>,
    %c0_47 = arith.constant 0 : index
    %c19_48 = arith.constant 19 : index
    %66 = vector.load %arg8[%c0_47, %c19_48] : memref<4x326xf32, #tpu.memory_space<vmem>>, vector<4x288xf32>
    tpu.vector_store %arg8[%c0_47, %c19_48], %61 {strides = array<i32>} : memref<4x326xf32, #tpu.memory_space<vmem>>, vector<4x288xf32>,
    %c0_49 = arith.constant 0 : index
    %c0_50 = arith.constant 0 : index
    %67 = vector.load %arg8[%c0_49, %c0_50] : memref<4x326xf32, #tpu.memory_space<vmem>>, vector<4x288xf32>
    %c0_51 = arith.constant 0 : index
    %c0_52 = arith.constant 0 : index
    %68 = vector.load %arg7[%c0_51, %c0_52] : memref<36x288xf32, #tpu.memory_space<vmem>>, vector<4x288xf32>
    tpu.vector_store %arg7[%c0_51, %c0_52], %67 {strides = array<i32>} : memref<36x288xf32, #tpu.memory_space<vmem>>, vector<4x288xf32>,
    %c0_53 = arith.constant 0 : index
    %c1_54 = arith.constant 1 : index
    %69 = vector.load %arg8[%c0_53, %c1_54] : memref<4x326xf32, #tpu.memory_space<vmem>>, vector<4x288xf32>
    %c4_55 = arith.constant 4 : index
    %c0_56 = arith.constant 0 : index
    %70 = vector.load %arg7[%c4_55, %c0_56] : memref<36x288xf32, #tpu.memory_space<vmem>>, vector<4x288xf32>
    tpu.vector_store %arg7[%c4_55, %c0_56], %69 {strides = array<i32>} : memref<36x288xf32, #tpu.memory_space<vmem>>, vector<4x288xf32>,
    %c0_57 = arith.constant 0 : index
    %c2_58 = arith.constant 2 : index
    %71 = vector.load %arg8[%c0_57, %c2_58] : memref<4x326xf32, #tpu.memory_space<vmem>>, vector<4x288xf32>
    %c8_59 = arith.constant 8 : index
    %c0_60 = arith.constant 0 : index
    %72 = vector.load %arg7[%c8_59, %c0_60] : memref<36x288xf32, #tpu.memory_space<vmem>>, vector<4x288xf32>
    tpu.vector_store %arg7[%c8_59, %c0_60], %71 {strides = array<i32>} : memref<36x288xf32, #tpu.memory_space<vmem>>, vector<4x288xf32>,
    %c0_61 = arith.constant 0 : index
    %c18_62 = arith.constant 18 : index
    %73 = vector.load %arg8[%c0_61, %c18_62] : memref<4x326xf32, #tpu.memory_space<vmem>>, vector<4x288xf32>
    %c12_63 = arith.constant 12 : index
    %c0_64 = arith.constant 0 : index
    %74 = vector.load %arg7[%c12_63, %c0_64] : memref<36x288xf32, #tpu.memory_space<vmem>>, vector<4x288xf32>
    tpu.vector_store %arg7[%c12_63, %c0_64], %73 {strides = array<i32>} : memref<36x288xf32, #tpu.memory_space<vmem>>, vector<4x288xf32>,
    %c0_65 = arith.constant 0 : index
    %c19_66 = arith.constant 19 : index
    %75 = vector.load %arg8[%c0_65, %c19_66] : memref<4x326xf32, #tpu.memory_space<vmem>>, vector<4x288xf32>
    %c16_67 = arith.constant 16 : index
    %c0_68 = arith.constant 0 : index
    %76 = vector.load %arg7[%c16_67, %c0_68] : memref<36x288xf32, #tpu.memory_space<vmem>>, vector<4x288xf32>
    tpu.vector_store %arg7[%c16_67, %c0_68], %75 {strides = array<i32>} : memref<36x288xf32, #tpu.memory_space<vmem>>, vector<4x288xf32>,
    %c0_69 = arith.constant 0 : index
    %c20_70 = arith.constant 20 : index
    %77 = vector.load %arg8[%c0_69, %c20_70] : memref<4x326xf32, #tpu.memory_space<vmem>>, vector<4x288xf32>
    %c20_71 = arith.constant 20 : index
    %c0_72 = arith.constant 0 : index
    %78 = vector.load %arg7[%c20_71, %c0_72] : memref<36x288xf32, #tpu.memory_space<vmem>>, vector<4x288xf32>
    tpu.vector_store %arg7[%c20_71, %c0_72], %77 {strides = array<i32>} : memref<36x288xf32, #tpu.memory_space<vmem>>, vector<4x288xf32>,
    %c0_73 = arith.constant 0 : index
    %c36_74 = arith.constant 36 : index
    %79 = vector.load %arg8[%c0_73, %c36_74] : memref<4x326xf32, #tpu.memory_space<vmem>>, vector<4x288xf32>
    %c24_75 = arith.constant 24 : index
    %c0_76 = arith.constant 0 : index
    %80 = vector.load %arg7[%c24_75, %c0_76] : memref<36x288xf32, #tpu.memory_space<vmem>>, vector<4x288xf32>
    tpu.vector_store %arg7[%c24_75, %c0_76], %79 {strides = array<i32>} : memref<36x288xf32, #tpu.memory_space<vmem>>, vector<4x288xf32>,
    %c0_77 = arith.constant 0 : index
    %c37_78 = arith.constant 37 : index
    %81 = vector.load %arg8[%c0_77, %c37_78] : memref<4x326xf32, #tpu.memory_space<vmem>>, vector<4x288xf32>
    %c28_79 = arith.constant 28 : index
    %c0_80 = arith.constant 0 : index
    %82 = vector.load %arg7[%c28_79, %c0_80] : memref<36x288xf32, #tpu.memory_space<vmem>>, vector<4x288xf32>
    tpu.vector_store %arg7[%c28_79, %c0_80], %81 {strides = array<i32>} : memref<36x288xf32, #tpu.memory_space<vmem>>, vector<4x288xf32>,
    %c0_81 = arith.constant 0 : index
    %c38_82 = arith.constant 38 : index
    %83 = vector.load %arg8[%c0_81, %c38_82] : memref<4x326xf32, #tpu.memory_space<vmem>>, vector<4x288xf32>
    %c32_83 = arith.constant 32 : index
    %c0_84 = arith.constant 0 : index
    %84 = vector.load %arg7[%c32_83, %c0_84] : memref<36x288xf32, #tpu.memory_space<vmem>>, vector<4x288xf32>
    tpu.vector_store %arg7[%c32_83, %c0_84], %83 {strides = array<i32>} : memref<36x288xf32, #tpu.memory_space<vmem>>, vector<4x288xf32>,
    %c0_85 = arith.constant 0 : index
    %c0_86 = arith.constant 0 : index
    %85 = vector.load %arg4[%c0_85, %c0_86] : memref<4x36xf32, #tpu.memory_space<vmem>>, vector<4x36xf32>
    %c0_87 = arith.constant 0 : index
    %c0_88 = arith.constant 0 : index
    %86 = vector.load %arg7[%c0_87, %c0_88] : memref<36x288xf32, #tpu.memory_space<vmem>>, vector<36x288xf32>
    %cst_89 = arith.constant dense<0.000000e+00> : vector<4x288xf32>
    %87 = tpu.matmul %85, %86, %cst_89 {dimension_numbers = #tpu.dot_dimension_numbers<[1], [0], [0], [1], [0, 0, 1, 1], [], []>} : vector<4x36xf32>, vector<36x288xf32>, vector<4x288xf32> -> vector<4x288xf32>
    %c0_90 = arith.constant 0 : index
    %c0_91 = arith.constant 0 : index
    %88 = vector.load %arg5[%c0_90, %c0_91] : memref<4x1xf32, #tpu.memory_space<vmem>>, vector<4x1xf32>
    %89 = vector.broadcast %88 : vector<4x1xf32> to vector<4x288xf32>
    %90 = arith.addf %87, %89 : vector<4x288xf32>
    %c0_92 = arith.constant 0 : index
    %c0_93 = arith.constant 0 : index
    %c19_94 = arith.constant 19 : index
    %91 = vector.load %arg1[%c0_92, %c0_93, %c19_94] : memref<1x4x326xf32, #tpu.memory_space<vmem>>, vector<1x4x288xf32>
    %92 = vector.shape_cast %91 : vector<1x4x288xf32> to vector<4x288xf32>
    %93 = arith.addf %90, %92 : vector<4x288xf32>
    %cst_95 = arith.constant 0.000000e+00 : f32
    %94 = vector.broadcast %cst_95 : f32 to vector<4x288xf32>
    %95 = arith.cmpf ogt, %93, %94 : vector<4x288xf32>
    %cst_96 = arith.constant 1.000000e-01 : f32
    %96 = vector.broadcast %cst_96 : f32 to vector<4x288xf32>
    %97 = arith.mulf %96, %93 : vector<4x288xf32>
    %98 = arith.select %95, %93, %97 : vector<4x288xi1>, vector<4x288xf32>
    %c0_97 = arith.constant 0 : index
    %c0_98 = arith.constant 0 : index
    %c0_99 = arith.constant 0 : index
    %99 = vector.load %arg6[%c0_97, %c0_98, %c0_99] : memref<1x4x288xf32, #tpu.memory_space<vmem>>, vector<1x4x288xf32>
    %100 = vector.shape_cast %99 : vector<1x4x288xf32> to vector<4x288xf32>
    %101 = vector.shape_cast %98 : vector<4x288xf32> to vector<1x4x288xf32>
    tpu.vector_store %arg6[%c0_97, %c0_98, %c0_99], %101 {strides = array<i32>} : memref<1x4x288xf32, #tpu.memory_space<vmem>>, vector<1x4x288xf32>,
    return
  }
  func.func @transform_0(%arg0: i32) -> (i32, i32, i32) {
    %c0_i32 = arith.constant 0 : i32
    %c0_i32_0 = arith.constant 0 : i32
    %c0_i32_1 = arith.constant 0 : i32
    return %arg0, %c0_i32, %c0_i32_0 : i32, i32, i32
  }
  func.func @transform_1(%arg0: i32) -> (i32, i32) {
    %c0_i32 = arith.constant 0 : i32
    %c0_i32_0 = arith.constant 0 : i32
    %c0_i32_1 = arith.constant 0 : i32
    return %c0_i32, %c0_i32_0 : i32, i32
  }
  func.func @transform_2(%arg0: i32) -> (i32, i32) {
    %c0_i32 = arith.constant 0 : i32
    %c0_i32_0 = arith.constant 0 : i32
    %c0_i32_1 = arith.constant 0 : i32
    return %c0_i32, %c0_i32_0 : i32, i32
  }
  func.func @transform_3(%arg0: i32) -> (i32, i32) {
    %c0_i32 = arith.constant 0 : i32
    %c0_i32_0 = arith.constant 0 : i32
    %c0_i32_1 = arith.constant 0 : i32
    return %c0_i32, %c0_i32_0 : i32, i32
  }
  func.func @transform_4(%arg0: i32) -> (i32, i32) {
    %c0_i32 = arith.constant 0 : i32
    %c0_i32_0 = arith.constant 0 : i32
    %c0_i32_1 = arith.constant 0 : i32
    return %c0_i32, %c0_i32_0 : i32, i32
  }
  func.func @transform_5(%arg0: i32) -> (i32, i32, i32) {
    %c0_i32 = arith.constant 0 : i32
    %c0_i32_0 = arith.constant 0 : i32
    %c0_i32_1 = arith.constant 0 : i32
    return %arg0, %c0_i32, %c0_i32_0 : i32, i32, i32
  }
}

</mosaic_0001>

<bundles_post_ra>
// kernel: tpu_custom_call.1
= control target key start
LH: loop header
LB: loop body
LE: loop exit
PB: predicated region body
PF: predicated region fallthrough
CT: control target
= control target key end

     0   :  { %10 = vsyncpa [#allocation5], 0  ;;  %s1700_s0 = inlined_call_operand.hbm [shape: f32[2,4,326], index: 0, kind: input, shape index: {}]   ;;  %s1701_s1 = inlined_call_operand.vmem [shape: f32[4,36], index: 1, kind: input, shape index: {}]   ;;  %s1702_s2 = inlined_call_operand.vmem [shape: f32[4,1], index: 2, kind: input, shape index: {}]   ;;  %s1703_s3 = inlined_call_operand.vmem [shape: f32[4,36], index: 3, kind: input, shape index: {}]   ;;  %s1704_s4 = inlined_call_operand.vmem [shape: f32[4,1], index: 4, kind: input, shape index: {}]   ;;  %s1705_s5 = inlined_call_operand.hbm [shape: f32[2,4,288], index: 5, kind: output, shape index: {}]  }
   0x1   :  { %12 = vsyncpa [#allocation5 + $0x1], 0 }
   0x2   :  { %13 = vsyncpa [#allocation6], 0 }
   0x3   :  { %15 = vsyncpa [#allocation6 + $0x1], 0  ;;  %s1368_s18 = smov 0   ;;  %s1370_s19 = smov 0  }
   0x4   :  { %s1372_s20 = smov 0   ;;  %s1374_s21 = smov 0  }
   0x5 LB: > { %s1389_s22 = sadd.s32 4294967295, %s1325_s21   ;;  %s1146_s23 = sadd.s32 4294967294, %s1325_s21   ;;  %s1325_s21 = sphi %s1374_s21, %s1748_s21   ;;  %s1321_s20 = sphi %s1372_s20, %s1747_s20   ;;  %s1317_s19 = sphi %s1370_s19, %s1746_s19   ;;  %s1313_s18 = sphi %s1368_s18, %s1745_s18  }
   0x6   : > { %s1393_s24 = sadd.s32 1, %s1325_s21   ;;  %s28_s25 = sadd.s32 1, %s1321_s20 }
   0x7   : > { %s25_s26 = ssub.s32 %s1325_s21, %s1393_s24  ;;  %p35_p0 = scmp.ne.s32.totalorder %s1321_s20, %s1317_s19 }
   0x8   : > { %p26_p1 = scmp.eq.s32.totalorder %s25_s26, 0  ;;  %p36_p2 = scmp.eq.s32.totalorder %s1325_s21, 0 }
   0x9   : > { %p41_p3 = scmp.ne.s32.totalorder %s1317_s19, %s1313_s18  ;;  %p42_p4 = scmp.eq.s32.totalorder %s1389_s22, 0 }
   0xa   : > { %s1405_s27 = scalar_select %p26_p1, %s1321_s20, %s28_s25  }
   0xb   : > { %p37_p5 = por %p36_p2, %p35_p0  ;;  %p1407_p6 = por %p42_p4, %p41_p3 }
   0xc   : > { %p149_p7 = scmp.eq.s32.totalorder %s1389_s22, 1  ;;  %p155_p8 = scmp.eq.s32.totalorder %s1146_s23, 1 }
   0xd   : > { %p1148_p9 = scmp.ge.s32.totalorder %s1325_s21, 2  ;;  %p1182_p10 = scmp.lt.s32.totalorder %s1325_s21, 2 }
   0xe   : > { %p1414_p11 = por %p149_p7, %p35_p0  ;;  %p1418_p12 = por %p155_p8, %p41_p3 }
   0xf   : > { %s187_s6 = sand.u32 1, %s1321_s20   ;;  %s1167_s7 = smul.u32 12, %s1325_s21 }
  0x10   : > { %s1166_s8 = smul.u32 12, %s187_s6  ;;  %p1427_p13 = pnand %p1182_p10, %p37_p5 }
  0x11   : > { %s196_s11 = scalar_lea.hbm %s1700_s0, %s1167_s7  ;;  %s188_s16 = scalar_lea.sflag [#allocation5], %s187_s6 }
  0x12   : > { %s198_s13 = sshll.u32 %s196_s11, 4  ;;  %s191_s14 = scalar_lea.vmem [#allocation4], %s1166_s8  ;;  %s199_s13 = int_to_ptr.hbm [resolvable:$true] %s198_s13 }
  0x13   : > { %s200_s15 = sshll.u32 %s191_s14, 4  ;;  %s1229_s17 = sshra.s32 %s199_s13, 4  ;;  %s201_s15 = int_to_ptr.vmem [resolvable:$true] %s200_s15  ;;  %s1230_s17 = int_to_ptr.hbm [resolvable:$true] %s1229_s17 }
  0x14   : > { %s1231_s23 = scalar_lea.hbm %s1230_s17, 12  ;;  %p1233_p1 = pneg %p1427_p13 }
  0x15   : > { %p1232_p0 = scmp.ne.s32.totalorder %s1230_s17, %s1231_s23  ;;  %s1236_s7 = scalar_lea.hbm %s1700_s0, 24 }
  0x16   : > { %p1237_p4 = scmp.lt.s32.totalorder %s1230_s17, %s1700_s0  ;;  %p1238_p5 = scmp.lt.s32.totalorder %s1236_s7, %s1231_s23 }
  0x17   : > { %p1234_p2 = pnand %p1233_p1, %p1232_p0 }
  0x18   : > { %p1239_p7 = por %p1238_p5, %p1237_p4 }
  0x19   : > { %p1235_p3 = pneg %p1234_p2 }
  0x1b   : > { %p1240_p8 = pnand %p1239_p7, %p1235_p3 }
  0x1d   : > { %1243 = shalt.err (!%p1240_p8)
}
  0x1e   : > { %1177 = dma.hbm_to_vmem [thread:$0]  (!%p1427_p13), %s199_s13, 192, %s201_s15, %s188_s16  }
  0x1f   : > { %p1150_p10 = scmp.ge.s32.totalorder %s1325_s21, 1  ;;  %p205_p0 = scmp.lt.s32.totalorder %s1325_s21, 3 }
  0x21   : > { %p206_p1 = pnand %p1150_p10, %p205_p0 }
  0x22   : > { %s1444_s6 = sand.u32 (!%p206_p1), 1, %s1317_s19  }
  0x23   : > { %209 = sbr.rel (%p206_p1) target bundleno = 878 (0x36e), region = 40  ;;  %s212_s11 = scalar_lea.sflag (!%p206_p1), [#allocation5], %s1444_s6 }
  0x24   : > { %s1168_s8 = smul.u32 (!%p206_p1), 12, %s1444_s6 }
  0x26   : > { %s1450_s14 = scalar_lea.vmem (!%p206_p1), [#allocation4], %s1168_s8 }
  0x28   : > { %1304 = dma.done.wait (%p1407_p6), %s212_s11, 192  }
  0x29   : > { %1306 = vsyncadd (%p1407_p6), %s212_s11, 4294967104  ;;  %v1457_v0 = vld [vmem:[%s1450_s14] sm:$0xff]  ;;  %v244_v1 = vld [vmem:[%s1450_s14 + $0x8] sm:$0xf]  ;;  %s1327_s28 = smov 127   ;;  %s1328_s12 = smov 126  }
  0x2a   : > { %247 = vst [vmem:[#allocation1] ss:$2 sm:$0xff] %v1457_v0  ;;  %v261_v2 = vld [vmem:[%s1450_s14 + $0x8] sm:$0xf]  ;;  %s1329_s13 = smov 110   ;;  %s1330_s15 = smov 109  }
  0x2b   : > { %249 = vst [vmem:[#allocation1 + $0x10] ss:$2 sm:$0xff] %v244_v1  ;;  %v288_v8 = vld [vmem:[%s1450_s14 + $0x8] sm:$0xf]  ;;  %s1331_s16 = smov 108   ;;  %s1332_s17 = smov 92  }
  0x2c   : > { %v313_v12 = vld [vmem:[%s1450_s14 + $0x8] sm:$0xf]  ;;  %s1333_s23 = smov 91   ;;  %s1334_s25 = smov 90   ;;  %vm258_vm0 = vcmask 257024   ;;  %vm1711_vm1 = vcmask 261124  }
  0x2d   : > { %v339_v16 = vld [vmem:[%s1450_s14 + $0x8] sm:$0xf]  ;;  %vm1707_vm2 = vcmask 1039360   ;;  %vm1715_vm3 = vcmask 1031168   ;;  %vm1714_vm4 = vcmask 900096   ;;  %vm1713_vm5 = vcmask 891904  }
  0x2e   : > { %v364_v20 = vld [vmem:[%s1450_s14 + $0x8] sm:$0xf]  ;;  %vm1712_vm6 = vcmask 883712   ;;  %vm1709_vm7 = vcmask 744448   ;;  %vm1710_vm8 = vcmask 752640   ;;  %vm1708_vm9 = vcmask 736256  }
  0x2f   : > { %v390_v24 = vld [vmem:[%s1450_s14 + $0x8] sm:$0xf]  ;;  %vm491_vm10 = vcmask 1043456   ;;  %vm1706_vm11 = vcmask 293888   ;;  %s1336_s11 = smov 19   ;;  %s1060_s7 = scalar_lea.sflag [#allocation6], %s1444_s6 }
  0x30   : > { %v415_v28 = vld [vmem:[%s1450_s14 + $0x8] sm:$0xf] }
  0x31   : > { %v250_v3 = vld.sshfl [vmem:[#allocation1] sm:$0xff pattern:$0x75316420]  ;;  %v251_v4 = vld.sshfl [vmem:[#allocation1 + $0x8] sm:$0xff pattern:$0x75316420] }
  0x32   : > { %265 = vst [vmem:[#allocation1 + $0x1] ss:$2 sm:$0xff] %v1457_v0  ;;  %v1463_v5 = vld.sshfl [vmem:[#allocation1 + $0x10] sm:$0xff pattern:$0x75316420] }
  0x33   : > { %256 = vst [vmem:[#allocation2] sm:$0xf] %v250_v3  ;;  %v441_v32 = vld [vmem:[%s1450_s14 + $0x8] sm:$0xf] }
  0x34   : > { %257 = vst [vmem:[#allocation2 + $0x8] sm:$0xf] %v251_v4 }
  0x35   : > { %267 = vst [vmem:[#allocation1 + $0x11] ss:$2 sm:$0xff] %v261_v2 }
  0x36   : > { %259 = vst.msk [vmem:[#allocation2 + $0x10] sm:$0xf] %vm258_vm0, %v1463_v5 }
  0x39   : > { %v269_v6 = vld.sshfl [vmem:[#allocation1 + $0x8] sm:$0xff pattern:$0x75316420]  ;;  %v1465_v7 = vld.sshfl [vmem:[#allocation1] sm:$0xff pattern:$0x75316420] }
  0x3a   : > { %273 = vrot.lane.b32.xlu1 %v269_v6, %s1327_s28  ;;  %291 = vst [vmem:[#allocation1] ss:$2 sm:$0xff] %v1457_v0 }
  0x3c   : > { %v270_v9 = vld.sshfl [vmem:[#allocation1 + $0x10] sm:$0xff pattern:$0x75316420] }
  0x3d   : > { %275 = vrot.lane.b32.xlu2 %v270_v9, %s1327_s28  ;;  %293 = vst [vmem:[#allocation1 + $0x10] ss:$2 sm:$0xff] %v288_v8  ;;  %v481_v8 = vld [vmem:[%s1702_s2] sm:$0xf]  ;;  %v1335_v9 = vmov 0  }
  0x3e   : > { %1227 = vset.pattern.permute.xlu0 %v1335_v9  ;;  %1228 = vset.pattern.permute.xlu1 %v1335_v9 }
  0x41   : > { %v295_v10 = vld.sshfl [vmem:[#allocation1 + $0x8] sm:$0xff pattern:$0x75316420]  ;;  %v1471_v11 = vld.sshfl [vmem:[#allocation1] sm:$0xff pattern:$0x75316420] }
  0x42   : > { %299 = vrot.lane.b32.xlu1 %v295_v10, %s1328_s12  ;;  %317 = vst [vmem:[#allocation1 + $0x1] ss:$2 sm:$0xff] %v1457_v0 }
  0x44   : > { %v296_v13 = vld.sshfl [vmem:[#allocation1 + $0x10] sm:$0xff pattern:$0x75316420] }
  0x45   : > { %301 = vrot.lane.b32.xlu2 %v296_v13, %s1328_s12  ;;  %319 = vst [vmem:[#allocation1 + $0x11] ss:$2 sm:$0xff] %v313_v12 }
  0x49   : > { %v321_v14 = vld.sshfl [vmem:[#allocation1 + $0x8] sm:$0xff pattern:$0x75316420]  ;;  %v320_v15 = vld.sshfl [vmem:[#allocation1] sm:$0xff pattern:$0x75316420] }
  0x4a   : > { %325 = vrot.lane.b32.xlu0 %v321_v14, %s1329_s13  ;;  %342 = vst [vmem:[#allocation1] ss:$2 sm:$0xff] %v1457_v0 }
  0x4c   : > { %v322_v17 = vld.sshfl [vmem:[#allocation1 + $0x10] sm:$0xff pattern:$0x75316420] }
  0x4d   : > { %327 = vrot.lane.b32.xlu1 %v322_v17, %s1329_s13  ;;  %344 = vst [vmem:[#allocation1 + $0x10] ss:$2 sm:$0xff] %v339_v16 }
  0x51   : > { %v346_v18 = vld.sshfl [vmem:[#allocation1 + $0x8] sm:$0xff pattern:$0x75316420]  ;;  %v345_v19 = vld.sshfl [vmem:[#allocation1] sm:$0xff pattern:$0x75316420] }
  0x52   : > { %368 = vst [vmem:[#allocation1 + $0x1] ss:$2 sm:$0xff] %v1457_v0 }
  0x54   : > { %v347_v21 = vld.sshfl [vmem:[#allocation1 + $0x10] sm:$0xff pattern:$0x75316420] }
  0x55   : > { %352 = vrot.lane.b32.xlu2 %v347_v21, %s1330_s15  ;;  %350 = vrot.lane.b32.xlu1 %v346_v18, %s1330_s15  ;;  %370 = vst [vmem:[#allocation1 + $0x11] ss:$2 sm:$0xff] %v364_v20 }
  0x59   : > { %v372_v22 = vld.sshfl [vmem:[#allocation1 + $0x8] sm:$0xff pattern:$0x75316420]  ;;  %v371_v23 = vld.sshfl [vmem:[#allocation1] sm:$0xff pattern:$0x75316420] }
  0x5a   : > { %376 = vrot.lane.b32.xlu0 %v372_v22, %s1331_s16  ;;  %393 = vst [vmem:[#allocation1] ss:$2 sm:$0xff] %v1457_v0 }
  0x5c   : > { %v373_v25 = vld.sshfl [vmem:[#allocation1 + $0x10] sm:$0xff pattern:$0x75316420] }
  0x5d   : > { %378 = vrot.lane.b32.xlu1 %v373_v25, %s1331_s16  ;;  %348 = vrot.lane.b32.xlu2 %v345_v19, %s1330_s15  ;;  %395 = vst [vmem:[#allocation1 + $0x10] ss:$2 sm:$0xff] %v390_v24  ;;  %v465_v24 = vld [vmem:[%s1701_s1] sm:$0xf] }
  0x61   : > { %v397_v26 = vld.sshfl [vmem:[#allocation1 + $0x8] sm:$0xff pattern:$0x75316420]  ;;  %v396_v27 = vld.sshfl [vmem:[#allocation1] sm:$0xff pattern:$0x75316420] }
  0x62   : > { %374 = vrot.lane.b32.xlu0 %v371_v23, %s1331_s16  ;;  %419 = vst [vmem:[#allocation1 + $0x1] ss:$2 sm:$0xff] %v1457_v0 }
  0x64   : > { %v398_v29 = vld.sshfl [vmem:[#allocation1 + $0x10] sm:$0xff pattern:$0x75316420] }
  0x65   : > { %401 = vrot.lane.b32.xlu1 %v397_v26, %s1332_s17  ;;  %399 = vrot.lane.b32.xlu2 %v396_v27, %s1332_s17  ;;  %421 = vst [vmem:[#allocation1 + $0x11] ss:$2 sm:$0xff] %v415_v28 }
  0x69   : > { %v423_v30 = vld.sshfl [vmem:[#allocation1 + $0x8] sm:$0xff pattern:$0x75316420]  ;;  %v422_v31 = vld.sshfl [vmem:[#allocation1] sm:$0xff pattern:$0x75316420] }
  0x6a   : > { %425 = vrot.lane.b32.xlu0 %v422_v31, %s1333_s23  ;;  %444 = vst [vmem:[#allocation1] ss:$2 sm:$0xff] %v1457_v0 }
  0x6c   : > { %v424_v33 = vld.sshfl [vmem:[#allocation1 + $0x10] sm:$0xff pattern:$0x75316420] }
  0x6d   : > { %403 = vrot.lane.b32.xlu1 %v398_v29, %s1332_s17  ;;  %427 = vrot.lane.b32.xlu2 %v423_v30, %s1333_s23  ;;  %446 = vst [vmem:[#allocation1 + $0x10] ss:$2 sm:$0xff] %v441_v32  ;;  %v570_v32 = vlaneseq }
  0x71   : > { %v448_v34 = vld.sshfl [vmem:[#allocation1 + $0x8] sm:$0xff pattern:$0x75316420]  ;;  %v447_v36 = vld.sshfl [vmem:[#allocation1] sm:$0xff pattern:$0x75316420] }
  0x72   : > { %452 = vrot.lane.b32.xlu0 %v448_v34, %s1334_s25 }
  0x74   : > { %v449_v35 = vld.sshfl [vmem:[#allocation1 + $0x10] sm:$0xff pattern:$0x75316420] }
  0x75   : > { %323 = vrot.lane.b32.xlu1 %v320_v15, %s1329_s13  ;;  %429 = vrot.lane.b32.xlu2 %v424_v33, %s1333_s23  ;;  %v1553_v33 = vand.u32 127, %v570_v32 }
  0x77   : > { %v1556_v34 = vadd.s32 256, %v1553_v33 }
  0x7a   : > { %454 = vrot.lane.b32.xlu0 %v449_v35, %s1334_s25  ;;  %v1559_v35 = vadd.s32 128, %v1553_v33 }
  0x7d   : > { %271 = vrot.lane.b32.xlu2 %v1465_v7, %s1327_s28 }
  0x82   : > { %450 = vrot.lane.b32.xlu0 %v447_v36, %s1334_s25  ;;  %v635_v36 = vand.u32 65535, %v1556_v34 }
  0x8a   : > { %297 = vrot.lane.b32.xlu0 %v1471_v11, %s1328_s12 }
  0x92   : > { %484 = vperm.xlu0 %1227, %v481_v8  }
  0x97   : > { %v276_v37 = vpop.permute.xlu2 %275 }
  0x98   : > { %286 = vst.msk [vmem:[#allocation2 + $0x10] sm:$0xf0] %vm1711_vm1, %v276_v37 }
  0x9f   : > { %v302_v38 = vpop.permute.xlu2 %301  ;;  %v468_v23 = vld [vmem:[#allocation2 + $0x10] sm:$0xff] }
  0xa0   : > { %311 = vst.msk [vmem:[#allocation2 + $0x28] sm:$0xf] %vm258_vm0, %v302_v38 }
  0xac   : > { %v274_v39 = vpop.permute.xlu1 %273 }
  0xad   : > { %v279_v40 = vsel %vm1707_vm2, %v274_v39, %v276_v37  ;;  %v606_v37 = vand.u32 65535, %v1559_v35 }
  0xae   : > { %284 = vst [vmem:[#allocation2 + $0x8] sm:$0xf0] %v279_v40  ;;  %v607_v40 = vshrl.u32 %v1559_v35, 16 }
  0xaf   : > { %v353_v41 = vpop.permute.xlu2 %352 }
  0xb0   : > { %362 = vst.msk [vmem:[#allocation2 + $0x40] sm:$0xf] %vm258_vm0, %v353_v41 }
  0xb4   : > { %v1515_v42 = vpop.permute.xlu1 %299 }
  0xb5   : > { %v305_v43 = vsel %vm1715_vm3, %v1515_v42, %v302_v38  ;;  %v467_v27 = vld [vmem:[#allocation2 + $0x8] sm:$0xff]  ;;  %v636_v38 = vshrl.u32 %v1556_v34, 16 }
  0xb6   : > { %310 = vst [vmem:[#allocation2 + $0x20] sm:$0xf] %v305_v43 }
  0xb7   : > { %v349_v44 = vpop.permute.xlu2 %348  ;;  %v640_v43 = vmul.u32 14564, %v636_v38 }
  0xbc   : > { %v326_v45 = vpop.permute.xlu0 %325 }
  0xbf   : > { %v328_v46 = vpop.permute.xlu1 %327  ;;  %v400_v47 = vpop.permute.xlu2 %399 }
  0xc0   : > { %337 = vst.msk [vmem:[#allocation2 + $0x28] sm:$0xf0] %vm1711_vm1, %v328_v46  ;;  %v331_v48 = vsel %vm1714_vm4, %v326_v45, %v328_v46  ;;  %v609_v46 = vmul.u32 14564, %v606_v37 }
  0xc1   : > { %336 = vst [vmem:[#allocation2 + $0x20] sm:$0xf0] %v331_v48 }
  0xc7   : > { %v351_v49 = vpop.permute.xlu1 %350  ;;  %v428_v50 = vpop.permute.xlu2 %427  ;;  %v471_v20 = vld [vmem:[#allocation2 + $0x28] sm:$0xff] }
  0xc8   : > { %v355_v51 = vsel %vm1713_vm5, %v349_v44, %v351_v49  ;;  %v356_v52 = vsel %vm1713_vm5, %v351_v49, %v353_v41  ;;  %v470_v21 = vld [vmem:[#allocation2 + $0x20] sm:$0xff]  ;;  %v610_v41 = vmul.u32 58254, %v606_v37  ;;  %v641_v49 = vmul.u32 58254, %v636_v38 }
  0xc9   : > { %360 = vst [vmem:[#allocation2 + $0x30] sm:$0xf] %v355_v51 }
  0xca   : > { %361 = vst [vmem:[#allocation2 + $0x38] sm:$0xf] %v356_v52  ;;  %v613_v48 = vshll.u32 %v610_v41, 16 }
  0xcc   : > { %v377_v53 = vpop.permute.xlu0 %376  ;;  %vm617_vm14 = vc.u32 %v609_v46, %v613_v48 }
  0xcf   : > { %v379_v54 = vpop.permute.xlu1 %378  ;;  %v430_v55 = vpop.permute.xlu2 %429 }
  0xd0   : > { %388 = vst.msk [vmem:[#allocation2 + $0x40] sm:$0xf0] %vm1711_vm1, %v379_v54  ;;  %v382_v56 = vsel %vm1712_vm6, %v377_v53, %v379_v54  ;;  %v433_v57 = vsel %vm1709_vm7, %v428_v50, %v430_v55 }
  0xd1   : > { %387 = vst [vmem:[#allocation2 + $0x38] sm:$0xf0] %v382_v56  ;;  %v612_v56 = vmul.u32 58254, %v607_v40 }
  0xd2   : > { %438 = vst [vmem:[#allocation2 + $0x50] sm:$0xf0] %v433_v57 }
  0xd3   : > { %439 = vst.msk [vmem:[#allocation2 + $0x58] sm:$0xf0] %vm1711_vm1, %v430_v55 }
  0xd4   : > { %v375_v58 = vpop.permute.xlu0 %374 }
  0xd5   : > { %v381_v59 = vsel %vm1712_vm6, %v375_v58, %v377_v53  ;;  %v578_v53 = vshrl.u32 %v1553_v33, 16 }
  0xd6   : > { %386 = vst [vmem:[#allocation2 + $0x30] sm:$0xf0] %v381_v59 }
  0xd7   : > { %v402_v60 = vpop.permute.xlu1 %401  ;;  %v272_v61 = vpop.permute.xlu2 %271  ;;  %v474_v18 = vld [vmem:[#allocation2 + $0x40] sm:$0xff]  ;;  %v582_v57 = vmul.u32 14564, %v578_v53 }
  0xd8   : > { %v406_v62 = vsel %vm1710_vm8, %v400_v47, %v402_v60  ;;  %v278_v63 = vsel %vm1707_vm2, %v272_v61, %v274_v39  ;;  %v473_v19 = vld [vmem:[#allocation2 + $0x38] sm:$0xff]  ;;  %v639_v39 = vmul.u32 58254, %v635_v36  ;;  %v611_v47 = vmul.u32 14564, %v607_v40 }
  0xd9   : > { %411 = vst [vmem:[#allocation2 + $0x48] sm:$0xf] %v406_v62  ;;  %v586_v61 = vshll.u32 %v582_v57, 16 }
  0xda   : > { %283 = vst [vmem:[#allocation2] sm:$0xf0] %v278_v63  ;;  %v642_v44 = vshll.u32 %v639_v39, 16  ;;  %v618_v63 = vsel %vm617_vm14, 1, %v1335_v9 }
  0xdc   : > { %v426_v1 = vpop.permute.xlu0 %425 }
  0xdd   : > { %v432_v2 = vsel %vm1709_vm7, %v426_v1, %v428_v50  ;;  %v472_v29 = vld [vmem:[#allocation2 + $0x30] sm:$0xff]  ;;  %v644_v50 = vshll.u32 %v640_v43, 16 }
  0xde   : > { %437 = vst [vmem:[#allocation2 + $0x48] sm:$0xf0] %v432_v2  ;;  %v583_v2 = vmul.u32 58254, %v578_v53 }
  0xdf   : > { %v404_v3 = vpop.permute.xlu1 %403 }
  0xe0   : > { %v407_v4 = vsel %vm1710_vm8, %v402_v60, %v404_v3  ;;  %413 = vst.msk [vmem:[#allocation2 + $0x58] sm:$0xf] %vm258_vm0, %v404_v3  ;;  %v615_v60 = vshll.u32 %v611_v47, 16 }
  0xe1   : > { %412 = vst [vmem:[#allocation2 + $0x50] sm:$0xf] %v407_v4  ;;  %v466_v31 = vld [vmem:[#allocation2] sm:$0xff]  ;;  %v619_v4 = vadd.s32 %v613_v48, %v609_v46 }
  0xe4   : > { %v453_v5 = vpop.permute.xlu0 %452 }
  0xe5   : > { %v475_v28 = vld [vmem:[#allocation2 + $0x48] sm:$0xff] }
  0xe7   : > { %v324_v6 = vpop.permute.xlu1 %323  ;;  %v477_v14 = vld [vmem:[#allocation2 + $0x58] sm:$0xff] }
  0xe8   : > { %v330_v7 = vsel %vm1714_vm4, %v324_v6, %v326_v45  ;;  %v476_v17 = vld [vmem:[#allocation2 + $0x50] sm:$0xff]  ;;  %v577_v45 = vand.u32 65535, %v1553_v33  ;;  %v643_v6 = vshrl.u32 %v639_v39, 16 }
  0xe9   : > { %335 = vst [vmem:[#allocation2 + $0x18] sm:$0xf0] %v330_v7 }
  0xea   : > { %v581_v54 = vmul.u32 58254, %v577_v45  ;;  %v580_v55 = vmul.u32 14564, %v577_v45 }
  0xec   : > { %v455_v10 = vpop.permute.xlu0 %454  ;;  %v584_v58 = vshll.u32 %v581_v54, 16 }
  0xed   : > { %v458_v11 = vsel %vm1708_vm9, %v453_v5, %v455_v10  ;;  %464 = vst.msk [vmem:[#allocation2 + $0x70] sm:$0xf] %vm258_vm0, %v455_v10  ;;  %v614_v10 = vshrl.u32 %v610_v41, 16 }
  0xee   : > { %463 = vst [vmem:[#allocation2 + $0x68] sm:$0xf] %v458_v11  ;;  %vm588_vm15 = vc.u32 %v580_v55, %v584_v58  ;;  %v590_v62 = vadd.s32 %v584_v58, %v580_v55 }
  0xef   : > { %v589_v3 = vsel %vm588_vm15, 1, %v1335_v9 }
  0xf0   : > { %v591_v8 = vadd.s32 %v589_v3, %v583_v2 }
  0xf4   : > { %v451_v12 = vpop.permute.xlu0 %450  ;;  %v480_v13 = vld [vmem:[#allocation2 + $0x70] sm:$0xf] }
  0xf5   : > { %v457_v15 = vsel %vm1708_vm9, %v451_v12, %v453_v5  ;;  %1155 = vmatpush.msk.msra.mxu2 %vm491_vm10, %v480_v13  ;;  %v479_v16 = vld [vmem:[#allocation2 + $0x68] sm:$0xf]  ;;  %v620_v5 = vadd.s32 %v618_v63, %v612_v56 }
  0xf6   : > { %462 = vst [vmem:[#allocation2 + $0x60] sm:$0xf] %v457_v15  ;;  %1153 = vmatpush.msk.msra.mxu1 %vm491_vm10, %v479_v16  ;;  %v585_v16 = vshrl.u32 %v581_v54, 16 }
  0xf7   : > { %553 = vmatpush.msra.mxu2 %v477_v14  ;;  %v645_v14 = vshrl.u32 %v640_v43, 16 }
  0xf8   : > { %533 = vmatpush.msra.mxu1 %v476_v17 }
  0xf9   : > { %554 = vmatpush.msra.mxu2 %v474_v18  ;;  %v616_v18 = vshrl.u32 %v611_v47, 16 }
  0xfa   : > { %534 = vmatpush.msra.mxu1 %v473_v19 }
  0xfb   : > { %555 = vmatpush.msra.mxu2 %v471_v20 }
  0xfc   : > { %535 = vmatpush.msra.mxu1 %v470_v21  ;;  %v298_v22 = vpop.permute.xlu0 %297  ;;  %v587_v21 = vshrl.u32 %v582_v57, 16  ;;  %v1337_v57 = vmov 0.0  }
  0xfd   : > { %v304_v25 = vsel %vm1715_vm3, %v298_v22, %v1515_v42  ;;  %556 = vmatpush.msra.mxu2 %v468_v23  ;;  %v478_v26 = vld [vmem:[#allocation2 + $0x60] sm:$0xf]  ;;  %v638_v42 = vmul.u32 14564, %v635_v36 }
  0xfe   : > { %309 = vst [vmem:[#allocation2 + $0x18] sm:$0xf] %v304_v25  ;;  %1151 = vmatpush.msk.msra.mxu0 %vm491_vm10, %v478_v26  ;;  %536 = vmatpush.msra.mxu1 %v467_v27 }
  0xff   : > { %1156 = vmatmul.msk.f32.vlgmr.msra.gmra.mxu2 %vm1706_vm11, %v465_v24  ;;  %1154 = vmatmul.msk.f32.vlgmr.msra.gmra.mxu1 %vm1706_vm11, %v465_v24  ;;  %vm646_vm12 = vc.u32 %v638_v42, %v642_v44  ;;  %v648_v51 = vadd.s32 %v642_v44, %v638_v42 }
 0x100   : > { %513 = vmatpush.msra.mxu0 %v475_v28  ;;  %v647_v52 = vsel %vm646_vm12, 1, %v1335_v9  ;;  %vm592_vm12 = vc.u32 %v590_v62, %v586_v61 }
 0x101   : > { %vm650_vm13 = vc.u32 %v648_v51, %v644_v50  ;;  %v649_v59 = vadd.s32 %v647_v52, %v641_v49  ;;  %v593_v12 = vsel %vm592_vm12, 1, %v1335_v9 }
 0x102   : > { %514 = vmatpush.msra.mxu0 %v472_v29  ;;  %v651_v1 = vsel %vm650_vm13, 1, %v1335_v9  ;;  %v595_v17 = vadd.s32 %v593_v12, %v591_v8 }
 0x103   : > { %v653_v7 = vadd.s32 %v651_v1, %v649_v59 }
 0x104   : > { %v596_v22 = vadd.s32 %v595_v17, %v585_v16  ;;  %v485_v36 = vpop.permute.xlu0 %484 }
 0x105   : > { %v469_v30 = vld [vmem:[#allocation2 + $0x18] sm:$0xff]  ;;  %v654_v15 = vadd.s32 %v653_v7, %v643_v6 }
 0x106   : > { %515 = vmatpush.msra.mxu0 %v469_v30  ;;  %v597_v25 = vadd.s32 %v596_v22, %v587_v21 }
 0x107   : > { %v655_v20 = vadd.s32 %v654_v15, %v645_v14 }
 0x108   : > { %516 = vmatpush.msra.mxu0 %v466_v31  ;;  %v598_v28 = vshrl.u32 %v597_v25, 4 }
 0x109   : > { %1152 = vmatmul.msk.f32.vlgmr.msra.gmra.mxu0 %vm1706_vm11, %v465_v24  ;;  %vm621_vm11 = vc.u32 %v619_v4, %v615_v60  ;;  %v656_v24 = vshrl.u32 %v655_v20, 4 }
 0x10a   : > { %v622_v11 = vsel %vm621_vm11, 1, %v1335_v9  ;;  %v599_v9 = vmul.u32 18, %v598_v28 }
 0x10b   : > { %v624_v13 = vadd.s32 %v622_v11, %v620_v5  ;;  %v657_v27 = vmul.u32 18, %v656_v24 }
 0x10c   : > { %v600_v32 = vsub.s32 %v1553_v33, %v599_v9 }
 0x10d   : > { %v625_v19 = vadd.s32 %v624_v13, %v614_v10  ;;  %v658_v30 = vsub.s32 %v1556_v34, %v657_v27 }
 0x10e   : > { %vm661_vm9 = vcmp.ne.s32.totalorder %v600_v32, 0  ;;  %vm664_vm7 = vcmp.lt.s32.totalorder %v600_v32, 0  ;;  %v670_v34 = vadd.s32 18, %v600_v32 }
 0x10f   : > { %v626_v23 = vadd.s32 %v625_v19, %v616_v18  ;;  %vm663_vm11 = vcmp.ne.s32.totalorder %v658_v30, 0  ;;  %vm666_vm13 = vcmp.lt.s32.totalorder %v658_v30, 0  ;;  %v672_v37 = vadd.s32 18, %v658_v30  ;;  %vm667_vm8 = vmand %vm664_vm7, %vm661_vm9 }
 0x110   : > { %vm669_vm12 = vmand %vm666_vm13, %vm663_vm11  ;;  %v673_v44 = vsel %vm667_vm8, %v670_v34, %v600_v32  ;;  %vm711_vm9 = vcmask 412672  }
 0x111   : > { %v627_v26 = vshrl.u32 %v626_v23, 4  ;;  %v675_v41 = vsel %vm669_vm12, %v672_v37, %v658_v30  ;;  %vm679_vm12 = vcmp.eq.s32.totalorder %v673_v44, 17  ;;  %v1020_v37 = vld [vmem:[%s1450_s14 + $0x8] sm:$0xf]  ;;  %s1279_s14 = scalar_lea.hbm %s1705_s5, 24 }
 0x112   : > { %vm678_vm1 = vcmp.eq.s32.totalorder %v675_v41, 0  ;;  %vm681_vm6 = vcmp.eq.s32.totalorder %v675_v41, 17 }
 0x113   : > { %v628_v29 = vmul.u32 18, %v627_v26  ;;  %vm684_vm11 = vmor %vm678_vm1, %vm681_vm6  ;;  %vm688_vm1 = vcmask 150528   ;;  %vm702_vm6 = vcmask 154624  }
 0x114   : > { %689 = vst.msk [vmem:[#allocation3] sm:$0xf] %vm688_vm1, %v1337_v57 }
 0x115   : > { %v629_v31 = vsub.s32 %v1559_v35, %v628_v29 }
 0x117   : > { %vm662_vm14 = vcmp.ne.s32.totalorder %v629_v31, 0  ;;  %vm665_vm15 = vcmp.lt.s32.totalorder %v629_v31, 0  ;;  %v671_v38 = vadd.s32 18, %v629_v31 }
 0x118   : > { %vm668_vm2 = vmand %vm665_vm15, %vm662_vm14  ;;  %vm676_vm15 = vcmp.eq.s32.totalorder %v673_v44, 0 }
 0x119   : > { %v674_v42 = vsel %vm668_vm2, %v671_v38, %v629_v31  ;;  %vm682_vm7 = vmor %vm676_vm15, %vm679_vm12  ;;  %vm1723_vm15 = vcmask 883712   ;;  %vm1724_vm12 = vcmask 261124  }
 0x11a   : > { %vm677_vm4 = vcmp.eq.s32.totalorder %v674_v42, 0  ;;  %vm680_vm3 = vcmp.eq.s32.totalorder %v674_v42, 17 }
 0x11b   : > { %vm683_vm14 = vmor %vm677_vm4, %vm680_vm3  ;;  %vm690_vm3 = vcmask 568728   ;;  %vm707_vm4 = vcmask 1043608  }
 0x11c   : > { %691 = vst.msk [vmem:[#allocation3 + $0x8] sm:$0xf] %vm690_vm3, %v1337_v57  ;;  %vm1728_vm3 = vcmask 744448  }
 0x17c   : > { %v538_v39 = vpop.f32.mrf.mxu1 }
 0x17d   : > { %v539_v40 = vadd.f32 %v538_v39, %v485_v36 }
 0x17f   : > { %v565_v35 = vmul.f32 0.1, %v539_v40  ;;  %vm562_vm5 = vcmp.gt.f32.partialorder %v539_v40, 0.0 }
 0x181   : > { %v568_v46 = vsel %vm562_vm5, %v539_v40, %v565_v35  ;;  %vm708_vm5 = vcmask 1047556  }
 0x182   : > { %v558_v43 = vpop.f32.mrf.mxu2  ;;  %v686_v51 = vsel %vm683_vm14, 0.0, %v568_v46  ;;  %vm709_vm8 = vmor %vm708_vm5, %vm707_vm4  ;;  %vm1722_vm14 = vcmask 891904  }
 0x183   : > { %v559_v33 = vadd.f32 %v558_v43, %v485_v36  ;;  %v695_v54 = vrot.slane %v686_v51, 4  ;;  %vm1729_vm4 = vmmov %vm1728_vm3 }
 0x184   : > { %vm1730_vm5 = vmmov %vm1723_vm15 }
 0x185   : > { %vm563_vm13 = vcmp.gt.f32.partialorder %v559_v33, 0.0  ;;  %v566_v45 = vmul.f32 0.1, %v559_v33 }
 0x186   : > { %v518_v47 = vpop.f32.mrf.mxu0 }
 0x187   : > { %v519_v48 = vadd.f32 %v518_v47, %v485_v36  ;;  %v569_v49 = vsel %vm563_vm13, %v559_v33, %v566_v45  ;;  %vm1721_vm13 = vcmask 900096  }
 0x188   : > { %v687_v50 = vsel %vm684_vm11, 0.0, %v569_v49  ;;  %vm1720_vm11 = vcmask 1031168  }
 0x189   : > { %vm561_vm2 = vcmp.gt.f32.partialorder %v519_v48, 0.0  ;;  %v564_v52 = vmul.f32 0.1, %v519_v48  ;;  %699 = vrot.lane.b32.xlu2 %v687_v50, %s1336_s11 }
 0x18b   : > { %v567_v53 = vsel %vm561_vm2, %v519_v48, %v564_v52  ;;  %vm1725_vm2 = vcmask 752640  }
 0x18c   : > { %v685_v55 = vsel %vm682_vm7, 0.0, %v567_v53  ;;  %vm1726_vm7 = vmmov %vm1722_vm14 }
 0x18d   : > { %v696_v56 = vsel %vm491_vm10, %v685_v55, %v695_v54  ;;  %vm1727_vm1 = vmmov %vm1725_vm2 }
 0x18e   : > { %697 = vrot.lane.b32.xlu1 %v696_v56, %s1336_s11 }
 0x1e3   : > { %v700_v60 = vpop.permute.xlu2 %699 }
 0x200   : > { %v698_v58 = vpop.permute.xlu1 %697 }
 0x201   : > { %v701_v59 = vrot.slane %v698_v58, 4 }
 0x203   : > { %v703_v61 = vsel %vm702_vm6, %v701_v59, %v698_v58  ;;  %v704_v62 = vsel %vm702_vm6, %v701_v59, %v700_v60  ;;  %vm1731_vm6 = vmmov %vm1724_vm12 }
 0x204   : > { %710 = vst.msk [vmem:[#allocation3] sm:$0xff] %vm709_vm8, %v703_v61  ;;  %vm1732_vm8 = vcmask 736256  }
 0x205   : > { %712 = vst.msk [vmem:[#allocation3 + $0x8] sm:$0xf] %vm711_vm9, %v704_v62  ;;  %vm1733_vm9 = vmmov %vm1732_vm8 }
 0x20b   : > { %v1577_v63 = vld [vmem:[#allocation3] sm:$0xff] }
 0x20c   : > { %v714_v1 = vld [vmem:[#allocation3 + $0x8] sm:$0xf]  ;;  %717 = vst [vmem:[#allocation1] ss:$2 sm:$0xff] %v1577_v63 }
 0x20d   : > { %719 = vst [vmem:[#allocation1 + $0x10] ss:$2 sm:$0xff] %v714_v1  ;;  %v730_v2 = vld [vmem:[#allocation3 + $0x8] sm:$0xf] }
 0x20e   : > { %v755_v6 = vld [vmem:[#allocation3 + $0x8] sm:$0xf] }
 0x20f   : > { %v779_v11 = vld [vmem:[#allocation3 + $0x8] sm:$0xf] }
 0x210   : > { %v804_v15 = vld [vmem:[#allocation3 + $0x8] sm:$0xf] }
 0x211   : > { %v828_v19 = vld [vmem:[#allocation3 + $0x8] sm:$0xf] }
 0x212   : > { %v853_v23 = vld [vmem:[#allocation3 + $0x8] sm:$0xf] }
 0x213   : > { %v720_v3 = vld.sshfl [vmem:[#allocation1] sm:$0xff pattern:$0x75316420]  ;;  %v721_v4 = vld.sshfl [vmem:[#allocation1 + $0x8] sm:$0xff pattern:$0x75316420] }
 0x214   : > { %v722_v5 = vld.sshfl [vmem:[#allocation1 + $0x10] sm:$0xff pattern:$0x75316420]  ;;  %734 = vst [vmem:[#allocation1 + $0x1] ss:$2 sm:$0xff] %v1577_v63 }
 0x215   : > { %736 = vst [vmem:[#allocation1 + $0x11] ss:$2 sm:$0xff] %v730_v2  ;;  %v877_v27 = vld [vmem:[#allocation3 + $0x8] sm:$0xf] }
 0x216   : > { %726 = vst [vmem:[#allocation2] sm:$0xf] %v720_v3  ;;  %v902_v9 = vld [vmem:[#allocation3 + $0x8] sm:$0xf] }
 0x217   : > { %727 = vst [vmem:[#allocation2 + $0x8] sm:$0xf] %v721_v4 }
 0x218   : > { %728 = vst.msk [vmem:[#allocation2 + $0x10] sm:$0xf] %vm258_vm0, %v722_v5 }
 0x21b   : > { %v1582_v7 = vld.sshfl [vmem:[#allocation1 + $0x8] sm:$0xff pattern:$0x75316420]  ;;  %v737_v8 = vld.sshfl [vmem:[#allocation1] sm:$0xff pattern:$0x75316420] }
 0x21c   : > { %v739_v10 = vld.sshfl [vmem:[#allocation1 + $0x10] sm:$0xff pattern:$0x75316420]  ;;  %740 = vrot.lane.b32.xlu0 %v737_v8, %s1327_s28  ;;  %758 = vst [vmem:[#allocation1] ss:$2 sm:$0xff] %v1577_v63 }
 0x21d   : > { %760 = vst [vmem:[#allocation1 + $0x10] ss:$2 sm:$0xff] %v755_v6 }
 0x223   : > { %v762_v12 = vld.sshfl [vmem:[#allocation1 + $0x8] sm:$0xff pattern:$0x75316420]  ;;  %v761_v13 = vld.sshfl [vmem:[#allocation1] sm:$0xff pattern:$0x75316420] }
 0x224   : > { %v763_v14 = vld.sshfl [vmem:[#allocation1 + $0x10] sm:$0xff pattern:$0x75316420]  ;;  %766 = vrot.lane.b32.xlu1 %v762_v12, %s1328_s12  ;;  %764 = vrot.lane.b32.xlu0 %v761_v13, %s1328_s12  ;;  %783 = vst [vmem:[#allocation1 + $0x1] ss:$2 sm:$0xff] %v1577_v63 }
 0x225   : > { %785 = vst [vmem:[#allocation1 + $0x11] ss:$2 sm:$0xff] %v779_v11 }
 0x22b   : > { %v787_v16 = vld.sshfl [vmem:[#allocation1 + $0x8] sm:$0xff pattern:$0x75316420]  ;;  %v786_v17 = vld.sshfl [vmem:[#allocation1] sm:$0xff pattern:$0x75316420] }
 0x22c   : > { %791 = vrot.lane.b32.xlu0 %v787_v16, %s1329_s13  ;;  %789 = vrot.lane.b32.xlu2 %v786_v17, %s1329_s13  ;;  %807 = vst [vmem:[#allocation1] ss:$2 sm:$0xff] %v1577_v63  ;;  %v788_v18 = vld.sshfl [vmem:[#allocation1 + $0x10] sm:$0xff pattern:$0x75316420] }
 0x22d   : > { %809 = vst [vmem:[#allocation1 + $0x10] ss:$2 sm:$0xff] %v804_v15 }
 0x233   : > { %v811_v20 = vld.sshfl [vmem:[#allocation1 + $0x8] sm:$0xff pattern:$0x75316420]  ;;  %v810_v21 = vld.sshfl [vmem:[#allocation1] sm:$0xff pattern:$0x75316420] }
 0x234   : > { %815 = vrot.lane.b32.xlu2 %v811_v20, %s1330_s15  ;;  %813 = vrot.lane.b32.xlu1 %v810_v21, %s1330_s15  ;;  %832 = vst [vmem:[#allocation1 + $0x1] ss:$2 sm:$0xff] %v1577_v63  ;;  %v812_v22 = vld.sshfl [vmem:[#allocation1 + $0x10] sm:$0xff pattern:$0x75316420] }
 0x235   : > { %834 = vst [vmem:[#allocation1 + $0x11] ss:$2 sm:$0xff] %v828_v19 }
 0x23b   : > { %v836_v24 = vld.sshfl [vmem:[#allocation1 + $0x8] sm:$0xff pattern:$0x75316420]  ;;  %v835_v25 = vld.sshfl [vmem:[#allocation1] sm:$0xff pattern:$0x75316420] }
 0x23c   : > { %840 = vrot.lane.b32.xlu1 %v836_v24, %s1331_s16  ;;  %838 = vrot.lane.b32.xlu0 %v835_v25, %s1331_s16  ;;  %856 = vst [vmem:[#allocation1] ss:$2 sm:$0xff] %v1577_v63  ;;  %v837_v26 = vld.sshfl [vmem:[#allocation1 + $0x10] sm:$0xff pattern:$0x75316420] }
 0x23d   : > { %858 = vst [vmem:[#allocation1 + $0x10] ss:$2 sm:$0xff] %v853_v23 }
 0x243   : > { %v860_v28 = vld.sshfl [vmem:[#allocation1 + $0x8] sm:$0xff pattern:$0x75316420]  ;;  %v859_v29 = vld.sshfl [vmem:[#allocation1] sm:$0xff pattern:$0x75316420] }
 0x244   : > { %864 = vrot.lane.b32.xlu1 %v860_v28, %s1332_s17  ;;  %862 = vrot.lane.b32.xlu0 %v859_v29, %s1332_s17  ;;  %881 = vst [vmem:[#allocation1 + $0x1] ss:$2 sm:$0xff] %v1577_v63  ;;  %v861_v30 = vld.sshfl [vmem:[#allocation1 + $0x10] sm:$0xff pattern:$0x75316420] }
 0x245   : > { %883 = vst [vmem:[#allocation1 + $0x11] ss:$2 sm:$0xff] %v877_v27 }
 0x24b   : > { %v885_v31 = vld.sshfl [vmem:[#allocation1 + $0x8] sm:$0xff pattern:$0x75316420]  ;;  %v884_v32 = vld.sshfl [vmem:[#allocation1] sm:$0xff pattern:$0x75316420] }
 0x24c   : > { %866 = vrot.lane.b32.xlu1 %v861_v30, %s1332_s17  ;;  %889 = vrot.lane.b32.xlu0 %v885_v31, %s1333_s23  ;;  %905 = vst [vmem:[#allocation1] ss:$2 sm:$0xff] %v1577_v63  ;;  %v886_v36 = vld.sshfl [vmem:[#allocation1 + $0x10] sm:$0xff pattern:$0x75316420] }
 0x24d   : > { %887 = vrot.lane.b32.xlu2 %v884_v32, %s1333_s23  ;;  %907 = vst [vmem:[#allocation1 + $0x10] ss:$2 sm:$0xff] %v902_v9  ;;  %v925_v30 = vld [vmem:[%s1703_s3] sm:$0xf] }
 0x253   : > { %v908_v38 = vld.sshfl [vmem:[#allocation1] sm:$0xff pattern:$0x75316420]  ;;  %v909_v39 = vld.sshfl [vmem:[#allocation1 + $0x8] sm:$0xff pattern:$0x75316420] }
 0x254   : > { %842 = vrot.lane.b32.xlu0 %v837_v26, %s1331_s16  ;;  %v910_v40 = vld.sshfl [vmem:[#allocation1 + $0x10] sm:$0xff pattern:$0x75316420]  ;;  %911 = vrot.lane.b32.xlu1 %v908_v38, %s1334_s25  ;;  %1023 = vst [vmem:[#allocation1] ss:$2 sm:$0xff] %v1457_v0 }
 0x255   : > { %891 = vrot.lane.b32.xlu2 %v886_v36, %s1333_s23  ;;  %1025 = vst [vmem:[#allocation1 + $0x10] ss:$2 sm:$0xff] %v1020_v37  ;;  %v941_v0 = vld [vmem:[%s1704_s4] sm:$0xf] }
 0x25b   : > { %v1026_v34 = vld.sshfl [vmem:[#allocation1] sm:$0xff pattern:$0x75316420]  ;;  %v1027_v42 = vld.sshfl [vmem:[#allocation1 + $0x8] sm:$0xff pattern:$0x75316420] }
 0x25c   : > { %744 = vrot.lane.b32.xlu0 %v739_v10, %s1327_s28  ;;  %742 = vrot.lane.b32.xlu1 %v1582_v7, %s1327_s28  ;;  %v1028_v41 = vld.sshfl [vmem:[#allocation1 + $0x10] sm:$0xff pattern:$0x75316420] }
 0x25d   : > { %817 = vrot.lane.b32.xlu2 %v812_v22, %s1330_s15 }
 0x264   : > { %1033 = vrot.lane.b32.xlu0 %v1028_v41, %s1330_s15  ;;  %768 = vrot.lane.b32.xlu1 %v763_v14, %s1328_s12 }
 0x265   : > { %913 = vrot.lane.b32.xlu2 %v909_v39, %s1334_s25 }
 0x26c   : > { %944 = vperm.xlu1 %1228, %v941_v0  }
 0x26d   : > { %915 = vrot.lane.b32.xlu2 %v910_v40, %s1334_s25 }
 0x274   : > { %1029 = vrot.lane.b32.xlu1 %v1026_v34, %s1330_s15 }
 0x275   : > { %793 = vrot.lane.b32.xlu2 %v788_v18, %s1329_s13  ;;  %s1169_s13 = smul.u32 12, %s1389_s22  ;;  %s242_s22 = scalar_lea.vmem [#allocation7], %s1168_s8 }
 0x276   : > { %s1073_s25 = sshll.u32 %s242_s22, 4  ;;  %s1074_s25 = int_to_ptr.vmem [resolvable:$true] %s1073_s25 }
 0x277   : > { %s1071_s23 = scalar_lea.hbm %s1705_s5, %s1169_s13 }
 0x278   : > { %s1075_s26 = sshll.u32 %s1071_s23, 4  ;;  %s1076_s26 = int_to_ptr.hbm [resolvable:$true] %s1075_s26 }
 0x279   : > { %s1273_s9 = sshra.s32 %s1076_s26, 4  ;;  %s1274_s9 = int_to_ptr.hbm [resolvable:$true] %s1273_s9 }
 0x27a   : > { %s1275_s10 = scalar_lea.hbm %s1274_s9, 12  ;;  %p1280_p3 = scmp.lt.s32.totalorder %s1274_s9, %s1705_s5 }
 0x27b   : > { %p1276_p6 = scmp.ne.s32.totalorder %s1274_s9, %s1275_s10  ;;  %p1281_p4 = scmp.lt.s32.totalorder %s1279_s14, %s1275_s10 }
 0x27d   : > { %1031 = vrot.lane.b32.xlu2 %v1027_v42, %s1330_s15  ;;  %p1277_p13 = pnand %p1276_p6, %p1414_p11  ;;  %p1282_p5 = por %p1281_p4, %p1280_p3 }
 0x27f   : > { %p1278_p2 = pneg %p1277_p13 }
 0x281   : > { %p1283_p7 = pnand %p1282_p5, %p1278_p2 }
 0x286   : > { %v790_v43 = vpop.permute.xlu2 %789 }
 0x28e   : > { %v741_v35 = vpop.permute.xlu0 %740  ;;  %v816_v47 = vpop.permute.xlu2 %815 }
 0x296   : > { %v1624_v33 = vpop.permute.xlu1 %766  ;;  %v765_v44 = vpop.permute.xlu0 %764 }
 0x297   : > { %v770_v45 = vsel %vm1720_vm11, %v765_v44, %v1624_v33  ;;  %vm1734_vm11 = vmmov %vm1731_vm6 }
 0x298   : > { %775 = vst [vmem:[#allocation2 + $0x18] sm:$0xf] %v770_v45 }
 0x29e   : > { %v792_v46 = vpop.permute.xlu0 %791 }
 0x29f   : > { %v795_v48 = vsel %vm1721_vm13, %v790_v43, %v792_v46  ;;  %vm1735_vm13 = vcmask 1039360  }
 0x2a0   : > { %800 = vst [vmem:[#allocation2 + $0x18] sm:$0xf0] %v795_v48 }
 0x2a6   : > { %v814_v49 = vpop.permute.xlu1 %813 }
 0x2a7   : > { %v819_v50 = vsel %vm1722_vm14, %v814_v49, %v816_v47  ;;  %v888_v51 = vpop.permute.xlu2 %887  ;;  %vm1736_vm14 = vcmask 900096   ;;  %v929_v28 = vld [vmem:[#allocation2 + $0x18] sm:$0xff] }
 0x2a8   : > { %824 = vst [vmem:[#allocation2 + $0x30] sm:$0xf] %v819_v50 }
 0x2ae   : > { %v841_v52 = vpop.permute.xlu1 %840  ;;  %v839_v53 = vpop.permute.xlu0 %838 }
 0x2af   : > { %v844_v54 = vsel %vm1723_vm15, %v839_v53, %v841_v52  ;;  %v892_v55 = vpop.permute.xlu2 %891  ;;  %vm1737_vm15 = vmmov %vm1731_vm6 }
 0x2b0   : > { %849 = vst [vmem:[#allocation2 + $0x30] sm:$0xf0] %v844_v54 }
 0x2b1   : > { %900 = vst.msk [vmem:[#allocation2 + $0x58] sm:$0xf0] %vm1724_vm12, %v892_v55  ;;  %vm1738_vm12 = vmmov %vm1735_vm13 }
 0x2b6   : > { %v865_v56 = vpop.permute.xlu1 %864  ;;  %v863_v57 = vpop.permute.xlu0 %862 }
 0x2b7   : > { %v868_v58 = vsel %vm1725_vm2, %v863_v57, %v865_v56  ;;  %v818_v59 = vpop.permute.xlu2 %817  ;;  %v932_v25 = vld [vmem:[#allocation2 + $0x30] sm:$0xff]  ;;  %vm1739_vm2 = vcmask 1031168  }
 0x2b8   : > { %873 = vst [vmem:[#allocation2 + $0x48] sm:$0xf] %v868_v58  ;;  %v820_v60 = vsel %vm1726_vm7, %v816_v47, %v818_v59  ;;  %vm1740_vm7 = vcmask 293888  }
 0x2b9   : > { %825 = vst [vmem:[#allocation2 + $0x38] sm:$0xf] %v820_v60 }
 0x2ba   : > { %826 = vst.msk [vmem:[#allocation2 + $0x40] sm:$0xf] %vm258_vm0, %v818_v59 }
 0x2be   : > { %v867_v61 = vpop.permute.xlu1 %866  ;;  %v890_v62 = vpop.permute.xlu0 %889 }
 0x2bf   : > { %v869_v63 = vsel %vm1727_vm1, %v865_v56, %v867_v61  ;;  %875 = vst.msk [vmem:[#allocation2 + $0x58] sm:$0xf] %vm258_vm0, %v867_v61  ;;  %v893_v1 = vsel %vm1728_vm3, %v888_v51, %v890_v62  ;;  %v894_v2 = vsel %vm1729_vm4, %v890_v62, %v892_v55  ;;  %v914_v3 = vpop.permute.xlu2 %913  ;;  %vm1741_vm1 = vmmov %vm1740_vm7  ;;  %vm1743_vm4 = vcmask 891904  }
 0x2c0   : > { %874 = vst [vmem:[#allocation2 + $0x50] sm:$0xf] %v869_v63  ;;  %vm1742_vm3 = vmmov %vm1741_vm1 }
 0x2c1   : > { %898 = vst [vmem:[#allocation2 + $0x48] sm:$0xf0] %v893_v1 }
 0x2c2   : > { %899 = vst [vmem:[#allocation2 + $0x50] sm:$0xf0] %v894_v2 }
 0x2c6   : > { %v843_v4 = vpop.permute.xlu0 %842  ;;  %v912_v5 = vpop.permute.xlu1 %911  ;;  %v937_v21 = vld [vmem:[#allocation2 + $0x58] sm:$0xff] }
 0x2c7   : > { %v845_v6 = vsel %vm1730_vm5, %v841_v52, %v843_v4  ;;  %851 = vst.msk [vmem:[#allocation2 + $0x40] sm:$0xf0] %vm1731_vm6, %v843_v4  ;;  %v916_v7 = vpop.permute.xlu2 %915  ;;  %v917_v10 = vsel %vm1733_vm9, %v912_v5, %v914_v3  ;;  %vm1744_vm5 = vmmov %vm1743_vm4 }
 0x2c8   : > { %850 = vst [vmem:[#allocation2 + $0x38] sm:$0xf0] %v845_v6  ;;  %v918_v8 = vsel %vm1732_vm8, %v914_v3, %v916_v7  ;;  %v935_v22 = vld [vmem:[#allocation2 + $0x48] sm:$0xff] }
 0x2c9   : > { %923 = vst [vmem:[#allocation2 + $0x68] sm:$0xf] %v918_v8  ;;  %v936_v20 = vld [vmem:[#allocation2 + $0x50] sm:$0xff] }
 0x2ca   : > { %924 = vst.msk [vmem:[#allocation2 + $0x70] sm:$0xf] %vm258_vm0, %v916_v7 }
 0x2cb   : > { %922 = vst [vmem:[#allocation2 + $0x60] sm:$0xf] %v917_v10 }
 0x2ce   : > { %v745_v11 = vpop.permute.xlu0 %744  ;;  %v743_v12 = vpop.permute.xlu1 %742  ;;  %v934_v24 = vld [vmem:[#allocation2 + $0x40] sm:$0xff] }
 0x2cf   : > { %753 = vst.msk [vmem:[#allocation2 + $0x10] sm:$0xf0] %vm1734_vm11, %v745_v11  ;;  %v794_v13 = vpop.permute.xlu2 %793  ;;  %v746_v14 = vsel %vm1735_vm13, %v741_v35, %v743_v12  ;;  %v747_v16 = vsel %vm1738_vm12, %v743_v12, %v745_v11  ;;  %v933_v23 = vld [vmem:[#allocation2 + $0x38] sm:$0xff] }
 0x2d0   : > { %v796_v15 = vsel %vm1736_vm14, %v792_v46, %v794_v13  ;;  %802 = vst.msk [vmem:[#allocation2 + $0x28] sm:$0xf0] %vm1737_vm15, %v794_v13  ;;  %v939_v17 = vld [vmem:[#allocation2 + $0x68] sm:$0xf] }
 0x2d1   : > { %801 = vst [vmem:[#allocation2 + $0x20] sm:$0xf0] %v796_v15  ;;  %v940_v18 = vld [vmem:[#allocation2 + $0x70] sm:$0xf]  ;;  %1159 = vmatpush.msk.msrb.mxu0 %vm491_vm10, %v939_v17 }
 0x2d2   : > { %751 = vst [vmem:[#allocation2] sm:$0xf0] %v746_v14  ;;  %1161 = vmatpush.msk.msrb.mxu1 %vm491_vm10, %v940_v18  ;;  %v938_v19 = vld [vmem:[#allocation2 + $0x60] sm:$0xf] }
 0x2d3   : > { %752 = vst [vmem:[#allocation2 + $0x8] sm:$0xf0] %v747_v16  ;;  %1157 = vmatpush.msk.msra.mxu3 %vm491_vm10, %v938_v19  ;;  %991 = vmatpush.msrb.mxu0 %v936_v20 }
 0x2d4   : > { %1011 = vmatpush.msrb.mxu1 %v937_v21 }
 0x2d5   : > { %971 = vmatpush.msra.mxu3 %v935_v22  ;;  %992 = vmatpush.msrb.mxu0 %v933_v23 }
 0x2d6   : > { %1012 = vmatpush.msrb.mxu1 %v934_v24  ;;  %v769_v26 = vpop.permute.xlu1 %768  ;;  %v928_v32 = vld [vmem:[#allocation2 + $0x10] sm:$0xff]  ;;  %v1034_v38 = vpop.permute.xlu0 %1033 }
 0x2d7   : > { %972 = vmatpush.msra.mxu3 %v932_v25  ;;  %v771_v27 = vsel %vm1739_vm2, %v1624_v33, %v769_v26  ;;  %777 = vst.msk [vmem:[#allocation2 + $0x28] sm:$0xf] %vm258_vm0, %v769_v26  ;;  %v1032_v39 = vpop.permute.xlu2 %1031 }
 0x2d8   : > { %776 = vst [vmem:[#allocation2 + $0x20] sm:$0xf] %v771_v27  ;;  %v1036_v44 = vsel %vm1744_vm5, %v1032_v39, %v1034_v38 }
 0x2d9   : > { %973 = vmatpush.msra.mxu3 %v929_v28  ;;  %v926_v29 = vld [vmem:[#allocation2] sm:$0xff] }
 0x2da   : > { %v927_v36 = vld [vmem:[#allocation2 + $0x8] sm:$0xff] }
 0x2db   : > { %974 = vmatpush.msra.mxu3 %v926_v29 }
 0x2dc   : > { %1158 = vmatmul.msk.f32.vlgmr.msra.gmra.mxu3 %vm1740_vm7, %v925_v30 }
 0x2de   : > { %v931_v9 = vld [vmem:[#allocation2 + $0x28] sm:$0xff]  ;;  %v945_v37 = vpop.permute.xlu1 %944 }
 0x2df   : > { %1013 = vmatpush.msrb.mxu1 %v931_v9  ;;  %v930_v31 = vld [vmem:[#allocation2 + $0x20] sm:$0xff] }
 0x2e0   : > { %993 = vmatpush.msrb.mxu0 %v930_v31 }
 0x2e1   : > { %1014 = vmatpush.msrb.mxu1 %v928_v32 }
 0x2e2   : > { %994 = vmatpush.msrb.mxu0 %v927_v36  ;;  %1162 = vmatmul.msk.f32.vlgmr.msrb.gmra.mxu1 %vm1741_vm1, %v925_v30 }
 0x2e3   : > { %1160 = vmatmul.msk.f32.vlgmr.msrb.gmra.mxu0 %vm1742_vm3, %v925_v30 }
 0x2e6   : > { %v1030_v40 = vpop.permute.xlu1 %1029 }
 0x2e7   : > { %v1035_v43 = vsel %vm1743_vm4, %v1030_v40, %v1032_v39 }
 0x35f   : > { %v976_v41 = vpop.f32.mrf.mxu3  ;;  %v1016_v0 = vpop.f32.mrf.mxu1 }
 0x360   : > { %v977_v34 = vadd.f32 %v976_v41, %v945_v37  ;;  %v1017_v42 = vadd.f32 %v1016_v0, %v945_v37  ;;  %v996_v35 = vpop.f32.mrf.mxu0 }
 0x361   : > { %v997_v33 = vadd.f32 %v996_v35, %v945_v37 }
 0x362   : > { %v1040_v45 = vadd.f32 %v1035_v43, %v977_v34  ;;  %v1042_v46 = vadd.f32 %v1034_v38, %v1017_v42 }
 0x363   : > { %v1041_v47 = vadd.f32 %v1036_v44, %v997_v33 }
 0x364   : > { %vm1045_vm6 = vcmp.gt.f32.partialorder %v1042_v46, 0.0  ;;  %v1048_v48 = vmul.f32 0.1, %v1042_v46  ;;  %v1046_v49 = vmul.f32 0.1, %v1040_v45  ;;  %vm1043_vm9 = vcmp.gt.f32.partialorder %v1040_v45, 0.0 }
 0x365   : > { %vm1044_vm8 = vcmp.gt.f32.partialorder %v1041_v47, 0.0  ;;  %v1047_v50 = vmul.f32 0.1, %v1041_v47 }
 0x366   : > { %v1051_v51 = vsel %vm1045_vm6, %v1042_v46, %v1048_v48  ;;  %v1049_v54 = vsel %vm1043_vm9, %v1040_v45, %v1046_v49 }
 0x367   : > { %v1050_v52 = vsel %vm1044_vm8, %v1041_v47, %v1047_v50  ;;  %1058 = vst.msk [vmem:[%s242_s22 + $0x8] sm:$0xf] %vm258_vm0, %v1051_v51 }
 0x368   : > { %v1054_v53 = vrot.slane %v1050_v52, 4 }
 0x36a   : > { %v1055_v55 = vsel %vm491_vm10, %v1049_v54, %v1054_v53 }
 0x36b   : > { %1057 = vst [vmem:[%s242_s22] sm:$0xff] %v1055_v55 }
 0x36c   : > { %1286 = shalt.err (!%p1283_p7)
}
 0x36d   : > { %1172 = dma.vmem_to_hbm [thread:$0]  (%p1414_p11), %s1074_s25, 192, %s1076_s26, %s1060_s7  }
 0x36e PF: > { %s1087_s6 = sand.u32 1, %s1313_s18   ;;  %p1179_p8 = pnand %p1148_p9, %p1418_p12 }
 0x36f   : > { %s1088_s12 = scalar_lea.sflag [#allocation6], %s1087_s6 }
 0x370   : > { %p1180_p10 = pneg %p1179_p8 }
 0x372   : > { %1308 = dma.done.wait (%p1180_p10), %s1088_s12, 192  }
 0x373   : > { %1310 = vsyncadd (%p1180_p10), %s1088_s12, 4294967104  ;;  %p18_p0 = scmp.ge.s32.totalorder %s1393_s24, 4   ;;  %s1745_s18 = smov %s1317_s19 }
 0x374   : > { %s1746_s19 = smov %s1321_s20  ;;  %s1747_s20 = smov %s1405_s27 }
 0x375   : > { %s1748_s21 = smov %s1393_s24  ;;  %20 = sbr.rel (!%p18_p0) target bundleno = 5 (0x5), region = 112 }
 0x37a   :  { %1094 = vsyncpa [#allocation5], 1 }
 0x37b   :  { %1096 = vsyncpa [#allocation5 + $0x1], 1 }
 0x37c   :  { %1097 = vsyncpa [#allocation6], 1 }
 0x37d   :  { %1099 = vsyncpa [#allocation6 + $0x1], 1 }

</bundles_post_ra>
